<compile_context>
chip_gen: v5e
topology: v5e:2x2
jax: 0.10.0
libtpu: 0.0.40
codegen_flags: <defaults>
</compile_context>

<pallas_src>
import jax
import jax.numpy as jnp
from jax.experimental import pallas as pl
from jax.experimental.pallas import tpu as pltpu

PAD = 8  # max |offset|: causal dilated conv, k=5, dilation=2 -> (k-1)*d = 8

# Unique shift offsets used by the 6 conv branches (+ avg-pool/skip folding).
OFFSETS = (-8, -6, -4, -2, -1, 0, 1, 2, 4)
NOFF = len(OFFSETS)
IDX_M1 = OFFSETS.index(-1)   # max-pool window x[l-1]
IDX_C0 = OFFSETS.index(0)    # max-pool window x[l]
IDX_P1 = OFFSETS.index(1)    # max-pool window x[l+1]

# TODO(synk): Conv1D/DilConv1D/CausalDilConv1D sources not provided; assume full
# (non-depthwise) convs, "same"-length zero padding, causal = left-pad-then-trim.
CONV_TAPS = (
    (-1, 0, 1),           # Conv1D          k=3
    (-2, 0, 2),           # DilConv1D       k=3 d=2
    (-4, -2, 0),          # CausalDilConv1D k=3 d=2
    (-2, -1, 0, 1, 2),    # Conv1D          k=5
    (-4, -2, 0, 2, 4),    # DilConv1D       k=5 d=2
    (-8, -6, -4, -2, 0),  # CausalDilConv1D k=5 d=2
)


# ----------------------------------------------------------------------------
# Kernels
# ----------------------------------------------------------------------------
def make_cell_kernel(num_node, Bt, L, H):
    """Fused SearchCell kernel: all edges (per-slot im2col + one wide matmul),
    node accumulation, attention sum, LayerNorm(eps=1e-8), relu, residual."""
    M = Bt * L

    def kernel(*refs):
        # inputs : x (Bt,L,H) bf16,
        #          per-slot folded weights w_s (9H, (num_node-s)*H) bf16,
        #          per-slot folded biases  b_s (1,  (num_node-s)*H) f32,
        #          amx (num_node,num_node) f32 SMEM  (max-pool alphas, [slot,node]),
        #          attn (num_node,) f32 SMEM, gamma/beta (1,H) f32
        # outputs: o (Bt,L,H) bf16
        # scratch: fm   (num_node, Bt, L+2*PAD, H) bf16  zero-haloed feature maps
        #          slab (Bt*L, 9*H)                bf16  im2col staging
        #          acc  (num_node, Bt*L, H)        f32   node accumulators
        x_ref = refs[0]
        w_refs = refs[1:1 + num_node]
        b_refs = refs[1 + num_node:1 + 2 * num_node]
        amx_ref, attn_ref, gamma_ref, beta_ref = refs[1 + 2 * num_node:5 + 2 * num_node]
        o_ref = refs[5 + 2 * num_node]
        fm_ref, slab_ref, acc_ref = refs[6 + 2 * num_node:]

        # Zero only the halo rows (interiors are fully rewritten every grid
        # step; halos are never written by the staging stores below).
        halo = jnp.zeros((PAD, H), dtype=fm_ref.dtype)
        for n in range(num_node):
            for b in range(Bt):
                fm_ref[n, b, 0:PAD, :] = halo
                fm_ref[n, b, PAD + L:PAD + L + PAD, :] = halo

        # Stage relu(cell input) into fm slot 0 (kept in bf16, no extra casts).
        for b in range(Bt):
            fm_ref[0, b, pl.ds(PAD, L), :] = jnp.maximum(x_ref[b], 0)

        for s in range(num_node):
            ncons = num_node - s                      # nodes fed by fm slot s
            # im2col slab: rows = Bt*L, columns = 9 shifted windows * H.
            for t, off in enumerate(OFFSETS):
                for b in range(Bt):
                    slab_ref[b * L:(b + 1) * L, t * H:(t + 1) * H] = \
                        fm_ref[s, b, pl.ds(PAD + off, L), :]
            slab = slab_ref[...]                      # (M, 9*H) bf16

            # All convs + avg-pool + skip of every edge fed by slot s:
            # ONE MXU matmul with K = 9*H, N = ncons*H (f32 accumulation).
            h_all = jnp.dot(slab, w_refs[s][...],
                            preferred_element_type=jnp.float32) + b_refs[s][...]

            # max-pool(k=3, s=1, pad=1) reuses the already staged -1/0/+1
            # windows (inputs are post-ReLU, so the zero halo acts like -inf).
            mx = jnp.maximum(
                jnp.maximum(slab[:, IDX_M1 * H:(IDX_M1 + 1) * H],
                            slab[:, IDX_C0 * H:(IDX_C0 + 1) * H]),
                slab[:, IDX_P1 * H:(IDX_P1 + 1) * H]).astype(jnp.float32)

            node_s = None
            for j_rel in range(ncons):
                j = s + j_rel                          # consumer node index
                contrib = (h_all[:, j_rel * H:(j_rel + 1) * H]
                           + amx_ref[s, j] * mx)
                new_val = contrib if s == 0 else acc_ref[j] + contrib
                acc_ref[j] = new_val
                if j == s:                             # node s just got its last input
                    node_s = new_val

            # Stage relu(node s output) for consumption by later edges.
            if s + 1 < num_node:
                for b in range(Bt):
                    fm_ref[s + 1, b, pl.ds(PAD, L), :] = jnp.maximum(
                        node_s[b * L:(b + 1) * L, :], 0.0).astype(fm_ref.dtype)

        # attention-weighted node sum -> LayerNorm(eps=1e-8) -> relu -> + x_in
        ssum = attn_ref[0] * acc_ref[0]
        for i in range(1, num_node):
            ssum = ssum + attn_ref[i] * acc_ref[i]
        mu = jnp.mean(ssum, axis=-1, keepdims=True)
        var = jnp.mean(ssum * ssum, axis=-1, keepdims=True) - mu * mu  # single pass
        y = (ssum - mu) * jax.lax.rsqrt(var + 1e-8)
        y = y * gamma_ref[...] + beta_ref[...]
        y = jnp.maximum(y, 0.0)                        # RESIDUAL_ACT_FN = relu
        for b in range(Bt):
            o_ref[b] = (y[b * L:(b + 1) * L, :]
                        + x_ref[b].astype(jnp.float32)).astype(o_ref.dtype)

    return kernel


def linear_kernel(x_ref, w_ref, b_ref, o_ref):
    o_ref[...] = (jnp.dot(x_ref[...], w_ref[...],
                          preferred_element_type=jnp.float32)
                  + b_ref[...]).astype(o_ref.dtype)


# ----------------------------------------------------------------------------
# Wrappers (pallas_call plumbing)
# ----------------------------------------------------------------------------
def _pick_block_batch(B, L, target_rows=256, max_bt=16):
    """Smallest divisor of B giving >= target_rows MXU rows (capped to bound
    trace-time unrolling); falls back to the largest allowed divisor."""
    best = 1
    for cand in range(1, B + 1):
        if B % cand != 0 or cand > max_bt:
            continue
        best = cand
        if cand * L >= target_rows:
            break
    return best


def fused_cell(x, slot_w, slot_b, amx, attn, gamma, beta):
    B, L, H = x.shape
    num_node = attn.shape[0]
    Bt = _pick_block_batch(B, L)

    const2 = lambda b: (0, 0)
    in_specs = [pl.BlockSpec((Bt, L, H), lambda b: (b, 0, 0))]
    in_specs += [pl.BlockSpec(w.shape, const2) for w in slot_w]
    in_specs += [pl.BlockSpec(bb.shape, const2) for bb in slot_b]
    in_specs += [
        pl.BlockSpec(memory_space=pltpu.MemorySpace.SMEM),   # amx (max-pool alphas)
        pl.BlockSpec(memory_space=pltpu.MemorySpace.SMEM),   # attention weights
        pl.BlockSpec((1, H), const2),                        # LayerNorm gamma
        pl.BlockSpec((1, H), const2),                        # LayerNorm beta
    ]

    return pl.pallas_call(
        make_cell_kernel(num_node, Bt, L, H),
        out_shape=jax.ShapeDtypeStruct((B, L, H), jnp.bfloat16),
        grid=(B // Bt,),
        in_specs=in_specs,
        out_specs=pl.BlockSpec((Bt, L, H), lambda b: (b, 0, 0)),
        scratch_shapes=[
            pltpu.VMEM((num_node, Bt, L + 2 * PAD, H), jnp.bfloat16),  # haloed fm
            pltpu.VMEM((Bt * L, NOFF * H), jnp.bfloat16),              # im2col slab
            pltpu.VMEM((num_node, Bt * L, H), jnp.float32),            # node accumulators
        ],
        compiler_params=pltpu.CompilerParams(
            dimension_semantics=("parallel",),
            vmem_limit_bytes=32 * 1024 * 1024),
    )(x, *slot_w, *slot_b, amx, attn, gamma.reshape(1, H), beta.reshape(1, H))


def linear(x2d, w, b, row_tile=512):
    """M-tiled (rows x H) @ (H x N) + bias, bf16 operands / f32 accumulation."""
    M, H = x2d.shape
    N = w.shape[1]
    Mt = M if M <= row_tile else row_tile
    return pl.pallas_call(
        linear_kernel,
        out_shape=jax.ShapeDtypeStruct((M, N), jnp.float32),
        grid=(pl.cdiv(M, Mt),),
        in_specs=[pl.BlockSpec((Mt, H), lambda i: (i, 0)),
                  pl.BlockSpec((H, N), lambda i: (0, 0)),
                  pl.BlockSpec((1, N), lambda i: (0, 0))],
        out_specs=pl.BlockSpec((Mt, N), lambda i: (i, 0)),
        compiler_params=pltpu.CompilerParams(
            dimension_semantics=("parallel",),
            vmem_limit_bytes=32 * 1024 * 1024),
    )(x2d.astype(jnp.bfloat16), w.astype(jnp.bfloat16),
      b.reshape(1, N).astype(jnp.float32))


# ----------------------------------------------------------------------------
# JAX-side alpha folding:  h = sum_c alpha_c * branch_c(relu(x))
# conv branches + avg-pool + skip become per-offset matrices; max-pool stays.
# ----------------------------------------------------------------------------
def fold_edge_params(edge_params, alpha, H):
    ws = [edge_params[2 * c] for c in range(6)]      # (k, H, H) each
    bs = [edge_params[2 * c + 1] for c in range(6)]  # (1, H) each
    eye = jnp.eye(H, dtype=jnp.float32)
    per_off = []
    for off in OFFSETS:
        acc = jnp.zeros((H, H), jnp.float32)
        for c, taps in enumerate(CONV_TAPS):
            for t, toff in enumerate(taps):
                if toff == off:
                    acc = acc + alpha[c] * ws[c][t]
        if off in (-1, 0, 1):                      # avg pool k=3, pad=1,
            acc = acc + (alpha[7] / 3.0) * eye     # count_include_pad=True
        if off == 0:
            acc = acc + alpha[8] * eye             # skip connect
        per_off.append(acc)
        # "none" branch (alpha[9]) contributes exactly 0
    wfold = jnp.stack(per_off, 0)                  # (NOFF, H, H) f32
    bfold = jnp.zeros((1, H), jnp.float32)
    for c in range(6):
        bfold = bfold + alpha[c] * bs[c]
    return wfold, bfold, alpha[6]                  # alpha[6]: max-pool weight


def fold_cell_params(cp, alpha_arch, H, num_node):
    # edge (node j, input slot s) exists for s <= j; slot s feeds nodes s..num_node-1
    folded = {}
    for j, node_edges in enumerate(cp["nodes"]):
        for s, ep in enumerate(node_edges):
            folded[(j, s)] = fold_edge_params(ep, alpha_arch[j, s], H)
    slot_w, slot_b = [], []
    amx = jnp.zeros((num_node, num_node), jnp.float32)
    for s in range(num_node):
        consumers = list(range(s, num_node))
        w_cat = jnp.concatenate([folded[(j, s)][0] for j in consumers], axis=-1)
        slot_w.append(w_cat.reshape(NOFF * H, len(consumers) * H).astype(jnp.bfloat16))
        slot_b.append(jnp.concatenate([folded[(j, s)][1] for j in consumers], axis=-1))
        for j in consumers:
            amx = amx.at[s, j].set(folded[(j, s)][2])
    return slot_w, slot_b, amx, jax.nn.softmax(cp["attention_w"])


# ----------------------------------------------------------------------------
# Model (glue in plain JAX)
# ----------------------------------------------------------------------------
def bert_embedding(tokens, tok_emb):
    # TODO(synk): BertEmbedding source not provided; assuming token embedding +
    # sinusoidal positional encoding + dropout (eval => identity), no segments.
    B, L = tokens.shape
    H = tok_emb.shape[1]
    pos = jnp.arange(L, dtype=jnp.float32)[:, None]
    i = jnp.arange(H)[None, :]
    angle = pos / jnp.power(10000.0, (2 * (i // 2)).astype(jnp.float32) / H)
    pe = jnp.where(i % 2 == 0, jnp.sin(angle), jnp.cos(angle))
    return tok_emb[tokens] + pe[None, :, :]


def search_model_forward(tokens, alpha_arch, params):
    B, L = tokens.shape
    H = params["tok_emb"].shape[1]
    T = params["emb_proj_w"].shape[1]
    C = params["out_w"].shape[1]
    num_cells = len(params["cells"])
    num_node = alpha_arch.shape[0]

    student_emb = bert_embedding(tokens, params["tok_emb"]).astype(jnp.bfloat16)

    x = student_emb
    cell_outs = []
    for cp in params["cells"]:
        slot_w, slot_b, amx, attn = fold_cell_params(cp, alpha_arch, H, num_node)
        x = fused_cell(x, slot_w, slot_b, amx, attn, cp["ln_gamma"], cp["ln_beta"])
        cell_outs.append(x)

    # Projections with exact FLOPs (no wasted weight columns per row block):
    #  - student rows   x emb_proj
    #  - all cell rows  x cells_proj (cells share the weight -> one stacked call)
    #  - last cell rows x out head   (dropout eval = identity; 'eye' activation)
    aligned_student_emb = linear(student_emb.reshape(B * L, H),
                                 params["emb_proj_w"],
                                 params["emb_proj_b"]).reshape(B, L, T)
    cells_rows = jnp.concatenate([c.reshape(B * L, H) for c in cell_outs], axis=0)
    aligned_all = linear(cells_rows, params["cells_proj_w"], params["cells_proj_b"])
    aligned_cells_out = [aligned_all[i * B * L:(i + 1) * B * L].reshape(B, L, T)
                         for i in range(num_cells)]
    out = linear(cell_outs[-1].reshape(B * L, H),
                 params["out_w"], params["out_b"]).reshape(B, L, C)
    return aligned_student_emb, aligned_cells_out, out


# ----------------------------------------------------------------------------
# Deterministic parameter construction
# ----------------------------------------------------------------------------
def make_edge_params(key, H):
    ks = jax.random.split(key, 12)
    parts = []
    for i, ksize in enumerate([3, 3, 3, 5, 5, 5]):
        w = 0.05 * jax.random.normal(ks[2 * i], (ksize, H, H), jnp.float32)
        b = 0.05 * jax.random.normal(ks[2 * i + 1], (1, H), jnp.float32)
        parts.extend([w, b])
    return tuple(parts)


def make_params(key, num_cells, num_node, vocab_size, teacher, H, num_class):
    keys = iter(jax.random.split(key, 1024))
    params = {
        "tok_emb": 0.02 * jax.random.normal(next(keys), (vocab_size, H), jnp.float32),
        "emb_proj_w": 0.01 * jax.random.normal(next(keys), (H, teacher), jnp.float32),
        "emb_proj_b": jnp.full((teacher,), 0.1, jnp.float32),
        "cells_proj_w": 0.01 * jax.random.normal(next(keys), (H, teacher), jnp.float32),
        "cells_proj_b": jnp.full((teacher,), 0.1, jnp.float32),
        "out_w": 0.02 * jax.random.normal(next(keys), (H, num_class), jnp.float32),
        "out_b": jnp.zeros((num_class,), jnp.float32),
        "cells": [],
    }
    for _ in range(num_cells):
        cell = {
            "attention_w": 0.01 * jax.random.normal(next(keys), (num_node,), jnp.float32),
            "ln_gamma": jnp.ones((H,), jnp.float32),
            "ln_beta": jnp.zeros((H,), jnp.float32),
            "nodes": [],
        }
        for node_idx in range(num_node):
            edges = [make_edge_params(next(keys), H) for _ in range(node_idx + 1)]
            cell["nodes"].append(edges)
        params["cells"].append(cell)
    return params


# ----------------------------------------------------------------------------
if __name__ == "__main__":
    num_cells, num_node = 2, 2
    vocab_size, teacher, H, num_class, max_len = 64, 64, 32, 4, 16
    B, L = 2, 8

    root = jax.random.PRNGKey(0)
    k_par, k_tok, k_alpha = jax.random.split(root, 3)

    params = make_params(k_par, num_cells, num_node, vocab_size, teacher, H, num_class)
    tokens = jax.random.randint(k_tok, (B, L), 0, vocab_size, dtype=jnp.int32)
    # alpha_arch[node_idx, edge_idx] is a 10-way op mixing vector
    alpha_arch = jax.nn.softmax(
        jax.random.normal(k_alpha, (num_node, num_node, 10), jnp.float32), axis=-1)

    forward = jax.jit(search_model_forward)
    aligned_student_emb, aligned_cells_out, out = forward(tokens, alpha_arch, params)

    jax.block_until_ready(aligned_student_emb)
    for a in aligned_cells_out:
        jax.block_until_ready(a)
    jax.block_until_ready(out)

    assert aligned_student_emb.shape == (B, L, teacher)
    assert all(a.shape == (B, L, teacher) for a in aligned_cells_out)
    assert out.shape == (B, L, num_class)
    print("KERNEL_OK")
</pallas_src>

<mosaic_0001>
module attributes {stable_mosaic.version = 11 : i64} {
  func.func @linear_kernel(%arg0: i32, %arg1: memref<16x32xbf16, #tpu.memory_space<vmem>>, %arg2: memref<32x64xbf16, #tpu.memory_space<vmem>>, %arg3: memref<1x64xf32, #tpu.memory_space<vmem>>, %arg4: memref<16x64xf32, #tpu.memory_space<vmem>>) attributes {dimension_semantics = [#tpu.dimension_semantics<parallel>], iteration_bounds = array<i64: 1>, scalar_prefetch = 0 : i64, scratch_operands = 0 : i64, tpu.core_type = #tpu.core_type<tc>, window_params = [{transform_indices = @transform_0, window_bounds = array<i64: 16, 32>}, {pipeline_mode = #tpu.pipeline_mode<synchronous>, transform_indices = @transform_1, window_bounds = array<i64: 32, 64>}, {pipeline_mode = #tpu.pipeline_mode<synchronous>, transform_indices = @transform_2, window_bounds = array<i64: 1, 64>}, {transform_indices = @transform_3, window_bounds = array<i64: 16, 64>}]} {
    %c0 = arith.constant 0 : index
    %c0_0 = arith.constant 0 : index
    %0 = vector.load %arg1[%c0, %c0_0] : memref<16x32xbf16, #tpu.memory_space<vmem>>, vector<16x32xbf16>
    %c0_1 = arith.constant 0 : index
    %c0_2 = arith.constant 0 : index
    %1 = vector.load %arg2[%c0_1, %c0_2] : memref<32x64xbf16, #tpu.memory_space<vmem>>, vector<32x64xbf16>
    %cst = arith.constant dense<0.000000e+00> : vector<16x64xf32>
    %2 = tpu.matmul %0, %1, %cst {dimension_numbers = #tpu.dot_dimension_numbers<[1], [0], [0], [1], [0, 0, 1, 1], [], []>} : vector<16x32xbf16>, vector<32x64xbf16>, vector<16x64xf32> -> vector<16x64xf32>
    %c0_3 = arith.constant 0 : index
    %c0_4 = arith.constant 0 : index
    %3 = vector.load %arg3[%c0_3, %c0_4] : memref<1x64xf32, #tpu.memory_space<vmem>>, vector<1x64xf32>
    %4 = vector.broadcast %3 : vector<1x64xf32> to vector<16x64xf32>
    %5 = arith.addf %2, %4 : vector<16x64xf32>
    %c0_5 = arith.constant 0 : index
    %c0_6 = arith.constant 0 : index
    %6 = vector.load %arg4[%c0_5, %c0_6] : memref<16x64xf32, #tpu.memory_space<vmem>>, vector<16x64xf32>
    tpu.vector_store %arg4[%c0_5, %c0_6], %5 {strides = array<i32>} : memref<16x64xf32, #tpu.memory_space<vmem>>, vector<16x64xf32>,
    return
  }
  func.func @transform_0(%arg0: i32) -> (i32, i32) {
    %c0_i32 = arith.constant 0 : i32
    %c0_i32_0 = arith.constant 0 : i32
    return %arg0, %c0_i32 : i32, i32
  }
  func.func @transform_1(%arg0: i32) -> (i32, i32) {
    %c0_i32 = arith.constant 0 : i32
    %c0_i32_0 = arith.constant 0 : i32
    %c0_i32_1 = arith.constant 0 : i32
    return %c0_i32, %c0_i32_0 : i32, i32
  }
  func.func @transform_2(%arg0: i32) -> (i32, i32) {
    %c0_i32 = arith.constant 0 : i32
    %c0_i32_0 = arith.constant 0 : i32
    %c0_i32_1 = arith.constant 0 : i32
    return %c0_i32, %c0_i32_0 : i32, i32
  }
  func.func @transform_3(%arg0: i32) -> (i32, i32) {
    %c0_i32 = arith.constant 0 : i32
    %c0_i32_0 = arith.constant 0 : i32
    return %arg0, %c0_i32 : i32, i32
  }
}

module attributes {stable_mosaic.version = 11 : i64} {
  func.func @kernel(%arg0: i32, %arg1: memref<2x8x32xbf16, #tpu.memory_space<vmem>>, %arg2: memref<288x64xbf16, #tpu.memory_space<vmem>>, %arg3: memref<288x32xbf16, #tpu.memory_space<vmem>>, %arg4: memref<1x64xf32, #tpu.memory_space<vmem>>, %arg5: memref<1x32xf32, #tpu.memory_space<vmem>>, %arg6: memref<2x2xf32, #tpu.memory_space<smem>>, %arg7: memref<2xf32, #tpu.memory_space<smem>>, %arg8: memref<1x32xf32, #tpu.memory_space<vmem>>, %arg9: memref<1x32xf32, #tpu.memory_space<vmem>>, %arg10: memref<2x8x32xbf16, #tpu.memory_space<vmem>>, %arg11: memref<2x2x24x32xbf16, #tpu.memory_space<vmem>>, %arg12: memref<16x288xbf16, #tpu.memory_space<vmem>>, %arg13: memref<2x16x32xf32, #tpu.memory_space<vmem>>) attributes {dimension_semantics = [#tpu.dimension_semantics<parallel>], iteration_bounds = array<i64: 1>, scalar_prefetch = 0 : i64, scratch_operands = 3 : i64, tpu.core_type = #tpu.core_type<tc>, window_params = [{transform_indices = @transform_0, window_bounds = array<i64: 2, 8, 32>}, {pipeline_mode = #tpu.pipeline_mode<synchronous>, transform_indices = @transform_1, window_bounds = array<i64: 288, 64>}, {pipeline_mode = #tpu.pipeline_mode<synchronous>, transform_indices = @transform_2, window_bounds = array<i64: 288, 32>}, {pipeline_mode = #tpu.pipeline_mode<synchronous>, transform_indices = @transform_3, window_bounds = array<i64: 1, 64>}, {pipeline_mode = #tpu.pipeline_mode<synchronous>, transform_indices = @transform_4, window_bounds = array<i64: 1, 32>}, {transform_indices = @transform_5, window_bounds = array<i64: 2, 2>}, {transform_indices = @transform_6, window_bounds = array<i64: 2>}, {pipeline_mode = #tpu.pipeline_mode<synchronous>, transform_indices = @transform_7, window_bounds = array<i64: 1, 32>}, {pipeline_mode = #tpu.pipeline_mode<synchronous>, transform_indices = @transform_8, window_bounds = array<i64: 1, 32>}, {transform_indices = @transform_9, window_bounds = array<i64: 2, 8, 32>}]} {
    %cst = arith.constant 0.000000e+00 : bf16
    %0 = vector.broadcast %cst : bf16 to vector<8x32xbf16>
    %c0 = arith.constant 0 : index
    %c0_0 = arith.constant 0 : index
    %c0_1 = arith.constant 0 : index
    %c0_2 = arith.constant 0 : index
    %1 = vector.load %arg11[%c0, %c0_0, %c0_1, %c0_2] : memref<2x2x24x32xbf16, #tpu.memory_space<vmem>>, vector<1x1x8x32xbf16>
    %2 = vector.shape_cast %1 : vector<1x1x8x32xbf16> to vector<8x32xbf16>
    %3 = vector.shape_cast %0 : vector<8x32xbf16> to vector<1x1x8x32xbf16>
    tpu.vector_store %arg11[%c0, %c0_0, %c0_1, %c0_2], %3 {strides = array<i32>} : memref<2x2x24x32xbf16, #tpu.memory_space<vmem>>, vector<1x1x8x32xbf16>,
    %c0_3 = arith.constant 0 : index
    %c0_4 = arith.constant 0 : index
    %c16 = arith.constant 16 : index
    %c0_5 = arith.constant 0 : index
    %4 = vector.load %arg11[%c0_3, %c0_4, %c16, %c0_5] : memref<2x2x24x32xbf16, #tpu.memory_space<vmem>>, vector<1x1x8x32xbf16>
    %5 = vector.shape_cast %4 : vector<1x1x8x32xbf16> to vector<8x32xbf16>
    %6 = vector.shape_cast %0 : vector<8x32xbf16> to vector<1x1x8x32xbf16>
    tpu.vector_store %arg11[%c0_3, %c0_4, %c16, %c0_5], %6 {strides = array<i32>} : memref<2x2x24x32xbf16, #tpu.memory_space<vmem>>, vector<1x1x8x32xbf16>,
    %c0_6 = arith.constant 0 : index
    %c1 = arith.constant 1 : index
    %c0_7 = arith.constant 0 : index
    %c0_8 = arith.constant 0 : index
    %7 = vector.load %arg11[%c0_6, %c1, %c0_7, %c0_8] : memref<2x2x24x32xbf16, #tpu.memory_space<vmem>>, vector<1x1x8x32xbf16>
    %8 = vector.shape_cast %7 : vector<1x1x8x32xbf16> to vector<8x32xbf16>
    %9 = vector.shape_cast %0 : vector<8x32xbf16> to vector<1x1x8x32xbf16>
    tpu.vector_store %arg11[%c0_6, %c1, %c0_7, %c0_8], %9 {strides = array<i32>} : memref<2x2x24x32xbf16, #tpu.memory_space<vmem>>, vector<1x1x8x32xbf16>,
    %c0_9 = arith.constant 0 : index
    %c1_10 = arith.constant 1 : index
    %c16_11 = arith.constant 16 : index
    %c0_12 = arith.constant 0 : index
    %10 = vector.load %arg11[%c0_9, %c1_10, %c16_11, %c0_12] : memref<2x2x24x32xbf16, #tpu.memory_space<vmem>>, vector<1x1x8x32xbf16>
    %11 = vector.shape_cast %10 : vector<1x1x8x32xbf16> to vector<8x32xbf16>
    %12 = vector.shape_cast %0 : vector<8x32xbf16> to vector<1x1x8x32xbf16>
    tpu.vector_store %arg11[%c0_9, %c1_10, %c16_11, %c0_12], %12 {strides = array<i32>} : memref<2x2x24x32xbf16, #tpu.memory_space<vmem>>, vector<1x1x8x32xbf16>,
    %c1_13 = arith.constant 1 : index
    %c0_14 = arith.constant 0 : index
    %c0_15 = arith.constant 0 : index
    %c0_16 = arith.constant 0 : index
    %13 = vector.load %arg11[%c1_13, %c0_14, %c0_15, %c0_16] : memref<2x2x24x32xbf16, #tpu.memory_space<vmem>>, vector<1x1x8x32xbf16>
    %14 = vector.shape_cast %13 : vector<1x1x8x32xbf16> to vector<8x32xbf16>
    %15 = vector.shape_cast %0 : vector<8x32xbf16> to vector<1x1x8x32xbf16>
    tpu.vector_store %arg11[%c1_13, %c0_14, %c0_15, %c0_16], %15 {strides = array<i32>} : memref<2x2x24x32xbf16, #tpu.memory_space<vmem>>, vector<1x1x8x32xbf16>,
    %c1_17 = arith.constant 1 : index
    %c0_18 = arith.constant 0 : index
    %c16_19 = arith.constant 16 : index
    %c0_20 = arith.constant 0 : index
    %16 = vector.load %arg11[%c1_17, %c0_18, %c16_19, %c0_20] : memref<2x2x24x32xbf16, #tpu.memory_space<vmem>>, vector<1x1x8x32xbf16>
    %17 = vector.shape_cast %16 : vector<1x1x8x32xbf16> to vector<8x32xbf16>
    %18 = vector.shape_cast %0 : vector<8x32xbf16> to vector<1x1x8x32xbf16>
    tpu.vector_store %arg11[%c1_17, %c0_18, %c16_19, %c0_20], %18 {strides = array<i32>} : memref<2x2x24x32xbf16, #tpu.memory_space<vmem>>, vector<1x1x8x32xbf16>,
    %c1_21 = arith.constant 1 : index
    %c1_22 = arith.constant 1 : index
    %c0_23 = arith.constant 0 : index
    %c0_24 = arith.constant 0 : index
    %19 = vector.load %arg11[%c1_21, %c1_22, %c0_23, %c0_24] : memref<2x2x24x32xbf16, #tpu.memory_space<vmem>>, vector<1x1x8x32xbf16>
    %20 = vector.shape_cast %19 : vector<1x1x8x32xbf16> to vector<8x32xbf16>
    %21 = vector.shape_cast %0 : vector<8x32xbf16> to vector<1x1x8x32xbf16>
    tpu.vector_store %arg11[%c1_21, %c1_22, %c0_23, %c0_24], %21 {strides = array<i32>} : memref<2x2x24x32xbf16, #tpu.memory_space<vmem>>, vector<1x1x8x32xbf16>,
    %c1_25 = arith.constant 1 : index
    %c1_26 = arith.constant 1 : index
    %c16_27 = arith.constant 16 : index
    %c0_28 = arith.constant 0 : index
    %22 = vector.load %arg11[%c1_25, %c1_26, %c16_27, %c0_28] : memref<2x2x24x32xbf16, #tpu.memory_space<vmem>>, vector<1x1x8x32xbf16>
    %23 = vector.shape_cast %22 : vector<1x1x8x32xbf16> to vector<8x32xbf16>
    %24 = vector.shape_cast %0 : vector<8x32xbf16> to vector<1x1x8x32xbf16>
    tpu.vector_store %arg11[%c1_25, %c1_26, %c16_27, %c0_28], %24 {strides = array<i32>} : memref<2x2x24x32xbf16, #tpu.memory_space<vmem>>, vector<1x1x8x32xbf16>,
    %c0_29 = arith.constant 0 : index
    %c0_30 = arith.constant 0 : index
    %c0_31 = arith.constant 0 : index
    %25 = vector.load %arg1[%c0_29, %c0_30, %c0_31] : memref<2x8x32xbf16, #tpu.memory_space<vmem>>, vector<1x8x32xbf16>
    %26 = vector.shape_cast %25 : vector<1x8x32xbf16> to vector<8x32xbf16>
    %cst_32 = arith.constant 0.000000e+00 : bf16
    %27 = vector.broadcast %cst_32 : bf16 to vector<8x32xbf16>
    %28 = arith.maximumf %26, %27 : vector<8x32xbf16>
    %c0_33 = arith.constant 0 : index
    %c0_34 = arith.constant 0 : index
    %c8 = arith.constant 8 : index
    %c0_35 = arith.constant 0 : index
    %29 = vector.load %arg11[%c0_33, %c0_34, %c8, %c0_35] : memref<2x2x24x32xbf16, #tpu.memory_space<vmem>>, vector<1x1x8x32xbf16>
    %30 = vector.shape_cast %29 : vector<1x1x8x32xbf16> to vector<8x32xbf16>
    %31 = vector.shape_cast %28 : vector<8x32xbf16> to vector<1x1x8x32xbf16>
    tpu.vector_store %arg11[%c0_33, %c0_34, %c8, %c0_35], %31 {strides = array<i32>} : memref<2x2x24x32xbf16, #tpu.memory_space<vmem>>, vector<1x1x8x32xbf16>,
    %c1_36 = arith.constant 1 : index
    %c0_37 = arith.constant 0 : index
    %c0_38 = arith.constant 0 : index
    %32 = vector.load %arg1[%c1_36, %c0_37, %c0_38] : memref<2x8x32xbf16, #tpu.memory_space<vmem>>, vector<1x8x32xbf16>
    %33 = vector.shape_cast %32 : vector<1x8x32xbf16> to vector<8x32xbf16>
    %cst_39 = arith.constant 0.000000e+00 : bf16
    %34 = vector.broadcast %cst_39 : bf16 to vector<8x32xbf16>
    %35 = arith.maximumf %33, %34 : vector<8x32xbf16>
    %c0_40 = arith.constant 0 : index
    %c1_41 = arith.constant 1 : index
    %c8_42 = arith.constant 8 : index
    %c0_43 = arith.constant 0 : index
    %36 = vector.load %arg11[%c0_40, %c1_41, %c8_42, %c0_43] : memref<2x2x24x32xbf16, #tpu.memory_space<vmem>>, vector<1x1x8x32xbf16>
    %37 = vector.shape_cast %36 : vector<1x1x8x32xbf16> to vector<8x32xbf16>
    %38 = vector.shape_cast %35 : vector<8x32xbf16> to vector<1x1x8x32xbf16>
    tpu.vector_store %arg11[%c0_40, %c1_41, %c8_42, %c0_43], %38 {strides = array<i32>} : memref<2x2x24x32xbf16, #tpu.memory_space<vmem>>, vector<1x1x8x32xbf16>,
    %c0_44 = arith.constant 0 : index
    %c0_45 = arith.constant 0 : index
    %c0_46 = arith.constant 0 : index
    %c0_47 = arith.constant 0 : index
    %39 = vector.load %arg11[%c0_44, %c0_45, %c0_46, %c0_47] : memref<2x2x24x32xbf16, #tpu.memory_space<vmem>>, vector<1x1x8x32xbf16>
    %40 = vector.shape_cast %39 : vector<1x1x8x32xbf16> to vector<8x32xbf16>
    %c0_48 = arith.constant 0 : index
    %c0_49 = arith.constant 0 : index
    %41 = vector.load %arg12[%c0_48, %c0_49] : memref<16x288xbf16, #tpu.memory_space<vmem>>, vector<8x32xbf16>
    tpu.vector_store %arg12[%c0_48, %c0_49], %40 {strides = array<i32>} : memref<16x288xbf16, #tpu.memory_space<vmem>>, vector<8x32xbf16>,
    %c0_50 = arith.constant 0 : index
    %c1_51 = arith.constant 1 : index
    %c0_52 = arith.constant 0 : index
    %c0_53 = arith.constant 0 : index
    %42 = vector.load %arg11[%c0_50, %c1_51, %c0_52, %c0_53] : memref<2x2x24x32xbf16, #tpu.memory_space<vmem>>, vector<1x1x8x32xbf16>
    %43 = vector.shape_cast %42 : vector<1x1x8x32xbf16> to vector<8x32xbf16>
    %c8_54 = arith.constant 8 : index
    %c0_55 = arith.constant 0 : index
    %44 = vector.load %arg12[%c8_54, %c0_55] : memref<16x288xbf16, #tpu.memory_space<vmem>>, vector<8x32xbf16>
    tpu.vector_store %arg12[%c8_54, %c0_55], %43 {strides = array<i32>} : memref<16x288xbf16, #tpu.memory_space<vmem>>, vector<8x32xbf16>,
    %c0_56 = arith.constant 0 : index
    %c0_57 = arith.constant 0 : index
    %c2 = arith.constant 2 : index
    %c0_58 = arith.constant 0 : index
    %45 = vector.load %arg11[%c0_56, %c0_57, %c2, %c0_58] : memref<2x2x24x32xbf16, #tpu.memory_space<vmem>>, vector<1x1x8x32xbf16>
    %46 = vector.shape_cast %45 : vector<1x1x8x32xbf16> to vector<8x32xbf16>
    %c0_59 = arith.constant 0 : index
    %c32 = arith.constant 32 : index
    %47 = vector.load %arg12[%c0_59, %c32] : memref<16x288xbf16, #tpu.memory_space<vmem>>, vector<8x32xbf16>
    tpu.vector_store %arg12[%c0_59, %c32], %46 {strides = array<i32>} : memref<16x288xbf16, #tpu.memory_space<vmem>>, vector<8x32xbf16>,
    %c0_60 = arith.constant 0 : index
    %c1_61 = arith.constant 1 : index
    %c2_62 = arith.constant 2 : index
    %c0_63 = arith.constant 0 : index
    %48 = vector.load %arg11[%c0_60, %c1_61, %c2_62, %c0_63] : memref<2x2x24x32xbf16, #tpu.memory_space<vmem>>, vector<1x1x8x32xbf16>
    %49 = vector.shape_cast %48 : vector<1x1x8x32xbf16> to vector<8x32xbf16>
    %c8_64 = arith.constant 8 : index
    %c32_65 = arith.constant 32 : index
    %50 = vector.load %arg12[%c8_64, %c32_65] : memref<16x288xbf16, #tpu.memory_space<vmem>>, vector<8x32xbf16>
    tpu.vector_store %arg12[%c8_64, %c32_65], %49 {strides = array<i32>} : memref<16x288xbf16, #tpu.memory_space<vmem>>, vector<8x32xbf16>,
    %c0_66 = arith.constant 0 : index
    %c0_67 = arith.constant 0 : index
    %c4 = arith.constant 4 : index
    %c0_68 = arith.constant 0 : index
    %51 = vector.load %arg11[%c0_66, %c0_67, %c4, %c0_68] : memref<2x2x24x32xbf16, #tpu.memory_space<vmem>>, vector<1x1x8x32xbf16>
    %52 = vector.shape_cast %51 : vector<1x1x8x32xbf16> to vector<8x32xbf16>
    %c0_69 = arith.constant 0 : index
    %c64 = arith.constant 64 : index
    %53 = vector.load %arg12[%c0_69, %c64] : memref<16x288xbf16, #tpu.memory_space<vmem>>, vector<8x32xbf16>
    tpu.vector_store %arg12[%c0_69, %c64], %52 {strides = array<i32>} : memref<16x288xbf16, #tpu.memory_space<vmem>>, vector<8x32xbf16>,
    %c0_70 = arith.constant 0 : index
    %c1_71 = arith.constant 1 : index
    %c4_72 = arith.constant 4 : index
    %c0_73 = arith.constant 0 : index
    %54 = vector.load %arg11[%c0_70, %c1_71, %c4_72, %c0_73] : memref<2x2x24x32xbf16, #tpu.memory_space<vmem>>, vector<1x1x8x32xbf16>
    %55 = vector.shape_cast %54 : vector<1x1x8x32xbf16> to vector<8x32xbf16>
    %c8_74 = arith.constant 8 : index
    %c64_75 = arith.constant 64 : index
    %56 = vector.load %arg12[%c8_74, %c64_75] : memref<16x288xbf16, #tpu.memory_space<vmem>>, vector<8x32xbf16>
    tpu.vector_store %arg12[%c8_74, %c64_75], %55 {strides = array<i32>} : memref<16x288xbf16, #tpu.memory_space<vmem>>, vector<8x32xbf16>,
    %c0_76 = arith.constant 0 : index
    %c0_77 = arith.constant 0 : index
    %c6 = arith.constant 6 : index
    %c0_78 = arith.constant 0 : index
    %57 = vector.load %arg11[%c0_76, %c0_77, %c6, %c0_78] : memref<2x2x24x32xbf16, #tpu.memory_space<vmem>>, vector<1x1x8x32xbf16>
    %58 = vector.shape_cast %57 : vector<1x1x8x32xbf16> to vector<8x32xbf16>
    %c0_79 = arith.constant 0 : index
    %c96 = arith.constant 96 : index
    %59 = vector.load %arg12[%c0_79, %c96] : memref<16x288xbf16, #tpu.memory_space<vmem>>, vector<8x32xbf16>
    tpu.vector_store %arg12[%c0_79, %c96], %58 {strides = array<i32>} : memref<16x288xbf16, #tpu.memory_space<vmem>>, vector<8x32xbf16>,
    %c0_80 = arith.constant 0 : index
    %c1_81 = arith.constant 1 : index
    %c6_82 = arith.constant 6 : index
    %c0_83 = arith.constant 0 : index
    %60 = vector.load %arg11[%c0_80, %c1_81, %c6_82, %c0_83] : memref<2x2x24x32xbf16, #tpu.memory_space<vmem>>, vector<1x1x8x32xbf16>
    %61 = vector.shape_cast %60 : vector<1x1x8x32xbf16> to vector<8x32xbf16>
    %c8_84 = arith.constant 8 : index
    %c96_85 = arith.constant 96 : index
    %62 = vector.load %arg12[%c8_84, %c96_85] : memref<16x288xbf16, #tpu.memory_space<vmem>>, vector<8x32xbf16>
    tpu.vector_store %arg12[%c8_84, %c96_85], %61 {strides = array<i32>} : memref<16x288xbf16, #tpu.memory_space<vmem>>, vector<8x32xbf16>,
    %c0_86 = arith.constant 0 : index
    %c0_87 = arith.constant 0 : index
    %c7 = arith.constant 7 : index
    %c0_88 = arith.constant 0 : index
    %63 = vector.load %arg11[%c0_86, %c0_87, %c7, %c0_88] : memref<2x2x24x32xbf16, #tpu.memory_space<vmem>>, vector<1x1x8x32xbf16>
    %64 = vector.shape_cast %63 : vector<1x1x8x32xbf16> to vector<8x32xbf16>
    %c0_89 = arith.constant 0 : index
    %c128 = arith.constant 128 : index
    %65 = vector.load %arg12[%c0_89, %c128] : memref<16x288xbf16, #tpu.memory_space<vmem>>, vector<8x32xbf16>
    tpu.vector_store %arg12[%c0_89, %c128], %64 {strides = array<i32>} : memref<16x288xbf16, #tpu.memory_space<vmem>>, vector<8x32xbf16>,
    %c0_90 = arith.constant 0 : index
    %c1_91 = arith.constant 1 : index
    %c7_92 = arith.constant 7 : index
    %c0_93 = arith.constant 0 : index
    %66 = vector.load %arg11[%c0_90, %c1_91, %c7_92, %c0_93] : memref<2x2x24x32xbf16, #tpu.memory_space<vmem>>, vector<1x1x8x32xbf16>
    %67 = vector.shape_cast %66 : vector<1x1x8x32xbf16> to vector<8x32xbf16>
    %c8_94 = arith.constant 8 : index
    %c128_95 = arith.constant 128 : index
    %68 = vector.load %arg12[%c8_94, %c128_95] : memref<16x288xbf16, #tpu.memory_space<vmem>>, vector<8x32xbf16>
    tpu.vector_store %arg12[%c8_94, %c128_95], %67 {strides = array<i32>} : memref<16x288xbf16, #tpu.memory_space<vmem>>, vector<8x32xbf16>,
    %c0_96 = arith.constant 0 : index
    %c0_97 = arith.constant 0 : index
    %c8_98 = arith.constant 8 : index
    %c0_99 = arith.constant 0 : index
    %69 = vector.load %arg11[%c0_96, %c0_97, %c8_98, %c0_99] : memref<2x2x24x32xbf16, #tpu.memory_space<vmem>>, vector<1x1x8x32xbf16>
    %70 = vector.shape_cast %69 : vector<1x1x8x32xbf16> to vector<8x32xbf16>
    %c0_100 = arith.constant 0 : index
    %c160 = arith.constant 160 : index
    %71 = vector.load %arg12[%c0_100, %c160] : memref<16x288xbf16, #tpu.memory_space<vmem>>, vector<8x32xbf16>
    tpu.vector_store %arg12[%c0_100, %c160], %70 {strides = array<i32>} : memref<16x288xbf16, #tpu.memory_space<vmem>>, vector<8x32xbf16>,
    %c0_101 = arith.constant 0 : index
    %c1_102 = arith.constant 1 : index
    %c8_103 = arith.constant 8 : index
    %c0_104 = arith.constant 0 : index
    %72 = vector.load %arg11[%c0_101, %c1_102, %c8_103, %c0_104] : memref<2x2x24x32xbf16, #tpu.memory_space<vmem>>, vector<1x1x8x32xbf16>
    %73 = vector.shape_cast %72 : vector<1x1x8x32xbf16> to vector<8x32xbf16>
    %c8_105 = arith.constant 8 : index
    %c160_106 = arith.constant 160 : index
    %74 = vector.load %arg12[%c8_105, %c160_106] : memref<16x288xbf16, #tpu.memory_space<vmem>>, vector<8x32xbf16>
    tpu.vector_store %arg12[%c8_105, %c160_106], %73 {strides = array<i32>} : memref<16x288xbf16, #tpu.memory_space<vmem>>, vector<8x32xbf16>,
    %c0_107 = arith.constant 0 : index
    %c0_108 = arith.constant 0 : index
    %c9 = arith.constant 9 : index
    %c0_109 = arith.constant 0 : index
    %75 = vector.load %arg11[%c0_107, %c0_108, %c9, %c0_109] : memref<2x2x24x32xbf16, #tpu.memory_space<vmem>>, vector<1x1x8x32xbf16>
    %76 = vector.shape_cast %75 : vector<1x1x8x32xbf16> to vector<8x32xbf16>
    %c0_110 = arith.constant 0 : index
    %c192 = arith.constant 192 : index
    %77 = vector.load %arg12[%c0_110, %c192] : memref<16x288xbf16, #tpu.memory_space<vmem>>, vector<8x32xbf16>
    tpu.vector_store %arg12[%c0_110, %c192], %76 {strides = array<i32>} : memref<16x288xbf16, #tpu.memory_space<vmem>>, vector<8x32xbf16>,
    %c0_111 = arith.constant 0 : index
    %c1_112 = arith.constant 1 : index
    %c9_113 = arith.constant 9 : index
    %c0_114 = arith.constant 0 : index
    %78 = vector.load %arg11[%c0_111, %c1_112, %c9_113, %c0_114] : memref<2x2x24x32xbf16, #tpu.memory_space<vmem>>, vector<1x1x8x32xbf16>
    %79 = vector.shape_cast %78 : vector<1x1x8x32xbf16> to vector<8x32xbf16>
    %c8_115 = arith.constant 8 : index
    %c192_116 = arith.constant 192 : index
    %80 = vector.load %arg12[%c8_115, %c192_116] : memref<16x288xbf16, #tpu.memory_space<vmem>>, vector<8x32xbf16>
    tpu.vector_store %arg12[%c8_115, %c192_116], %79 {strides = array<i32>} : memref<16x288xbf16, #tpu.memory_space<vmem>>, vector<8x32xbf16>,
    %c0_117 = arith.constant 0 : index
    %c0_118 = arith.constant 0 : index
    %c10 = arith.constant 10 : index
    %c0_119 = arith.constant 0 : index
    %81 = vector.load %arg11[%c0_117, %c0_118, %c10, %c0_119] : memref<2x2x24x32xbf16, #tpu.memory_space<vmem>>, vector<1x1x8x32xbf16>
    %82 = vector.shape_cast %81 : vector<1x1x8x32xbf16> to vector<8x32xbf16>
    %c0_120 = arith.constant 0 : index
    %c224 = arith.constant 224 : index
    %83 = vector.load %arg12[%c0_120, %c224] : memref<16x288xbf16, #tpu.memory_space<vmem>>, vector<8x32xbf16>
    tpu.vector_store %arg12[%c0_120, %c224], %82 {strides = array<i32>} : memref<16x288xbf16, #tpu.memory_space<vmem>>, vector<8x32xbf16>,
    %c0_121 = arith.constant 0 : index
    %c1_122 = arith.constant 1 : index
    %c10_123 = arith.constant 10 : index
    %c0_124 = arith.constant 0 : index
    %84 = vector.load %arg11[%c0_121, %c1_122, %c10_123, %c0_124] : memref<2x2x24x32xbf16, #tpu.memory_space<vmem>>, vector<1x1x8x32xbf16>
    %85 = vector.shape_cast %84 : vector<1x1x8x32xbf16> to vector<8x32xbf16>
    %c8_125 = arith.constant 8 : index
    %c224_126 = arith.constant 224 : index
    %86 = vector.load %arg12[%c8_125, %c224_126] : memref<16x288xbf16, #tpu.memory_space<vmem>>, vector<8x32xbf16>
    tpu.vector_store %arg12[%c8_125, %c224_126], %85 {strides = array<i32>} : memref<16x288xbf16, #tpu.memory_space<vmem>>, vector<8x32xbf16>,
    %c0_127 = arith.constant 0 : index
    %c0_128 = arith.constant 0 : index
    %c12 = arith.constant 12 : index
    %c0_129 = arith.constant 0 : index
    %87 = vector.load %arg11[%c0_127, %c0_128, %c12, %c0_129] : memref<2x2x24x32xbf16, #tpu.memory_space<vmem>>, vector<1x1x8x32xbf16>
    %88 = vector.shape_cast %87 : vector<1x1x8x32xbf16> to vector<8x32xbf16>
    %c0_130 = arith.constant 0 : index
    %c256 = arith.constant 256 : index
    %89 = vector.load %arg12[%c0_130, %c256] : memref<16x288xbf16, #tpu.memory_space<vmem>>, vector<8x32xbf16>
    tpu.vector_store %arg12[%c0_130, %c256], %88 {strides = array<i32>} : memref<16x288xbf16, #tpu.memory_space<vmem>>, vector<8x32xbf16>,
    %c0_131 = arith.constant 0 : index
    %c1_132 = arith.constant 1 : index
    %c12_133 = arith.constant 12 : index
    %c0_134 = arith.constant 0 : index
    %90 = vector.load %arg11[%c0_131, %c1_132, %c12_133, %c0_134] : memref<2x2x24x32xbf16, #tpu.memory_space<vmem>>, vector<1x1x8x32xbf16>
    %91 = vector.shape_cast %90 : vector<1x1x8x32xbf16> to vector<8x32xbf16>
    %c8_135 = arith.constant 8 : index
    %c256_136 = arith.constant 256 : index
    %92 = vector.load %arg12[%c8_135, %c256_136] : memref<16x288xbf16, #tpu.memory_space<vmem>>, vector<8x32xbf16>
    tpu.vector_store %arg12[%c8_135, %c256_136], %91 {strides = array<i32>} : memref<16x288xbf16, #tpu.memory_space<vmem>>, vector<8x32xbf16>,
    %c0_137 = arith.constant 0 : index
    %c0_138 = arith.constant 0 : index
    %93 = vector.load %arg12[%c0_137, %c0_138] : memref<16x288xbf16, #tpu.memory_space<vmem>>, vector<16x288xbf16>
    %c0_139 = arith.constant 0 : index
    %c0_140 = arith.constant 0 : index
    %94 = vector.load %arg2[%c0_139, %c0_140] : memref<288x64xbf16, #tpu.memory_space<vmem>>, vector<288x64xbf16>
    %cst_141 = arith.constant dense<0.000000e+00> : vector<16x64xf32>
    %95 = tpu.matmul %93, %94, %cst_141 {dimension_numbers = #tpu.dot_dimension_numbers<[1], [0], [0], [1], [0, 0, 1, 1], [], []>} : vector<16x288xbf16>, vector<288x64xbf16>, vector<16x64xf32> -> vector<16x64xf32>
    %c0_142 = arith.constant 0 : index
    %c0_143 = arith.constant 0 : index
    %96 = vector.load %arg4[%c0_142, %c0_143] : memref<1x64xf32, #tpu.memory_space<vmem>>, vector<1x64xf32>
    %97 = vector.broadcast %96 : vector<1x64xf32> to vector<16x64xf32>
    %98 = arith.addf %95, %97 : vector<16x64xf32>
    %99 = vector.extract_strided_slice %93 {offsets = [0, 128], sizes = [16, 32], strides = [1, 1]} : vector<16x288xbf16> to vector<16x32xbf16>
    %100 = vector.extract_strided_slice %93 {offsets = [0, 160], sizes = [16, 32], strides = [1, 1]} : vector<16x288xbf16> to vector<16x32xbf16>
    %101 = arith.maximumf %99, %100 : vector<16x32xbf16>
    %102 = vector.extract_strided_slice %93 {offsets = [0, 192], sizes = [16, 32], strides = [1, 1]} : vector<16x288xbf16> to vector<16x32xbf16>
    %103 = arith.maximumf %101, %102 : vector<16x32xbf16>
    %104 = arith.extf %103 : vector<16x32xbf16> to vector<16x32xf32>
    %105 = vector.extract_strided_slice %98 {offsets = [0, 0], sizes = [16, 32], strides = [1, 1]} : vector<16x64xf32> to vector<16x32xf32>
    %c0_144 = arith.constant 0 : index
    %c0_145 = arith.constant 0 : index
    %106 = memref.load %arg6[%c0_144, %c0_145] : memref<2x2xf32, #tpu.memory_space<smem>>
    %107 = vector.broadcast %106 : f32 to vector<16x32xf32>
    %108 = arith.mulf %107, %104 : vector<16x32xf32>
    %109 = arith.addf %105, %108 : vector<16x32xf32>
    %c0_146 = arith.constant 0 : index
    %c0_147 = arith.constant 0 : index
    %c0_148 = arith.constant 0 : index
    %110 = vector.load %arg13[%c0_146, %c0_147, %c0_148] : memref<2x16x32xf32, #tpu.memory_space<vmem>>, vector<1x16x32xf32>
    %111 = vector.shape_cast %110 : vector<1x16x32xf32> to vector<16x32xf32>
    %112 = vector.shape_cast %109 : vector<16x32xf32> to vector<1x16x32xf32>
    tpu.vector_store %arg13[%c0_146, %c0_147, %c0_148], %112 {strides = array<i32>} : memref<2x16x32xf32, #tpu.memory_space<vmem>>, vector<1x16x32xf32>,
    %113 = vector.extract_strided_slice %98 {offsets = [0, 32], sizes = [16, 32], strides = [1, 1]} : vector<16x64xf32> to vector<16x32xf32>
    %c0_149 = arith.constant 0 : index
    %c1_150 = arith.constant 1 : index
    %114 = memref.load %arg6[%c0_149, %c1_150] : memref<2x2xf32, #tpu.memory_space<smem>>
    %115 = vector.broadcast %114 : f32 to vector<16x32xf32>
    %116 = arith.mulf %115, %104 : vector<16x32xf32>
    %117 = arith.addf %113, %116 : vector<16x32xf32>
    %c1_151 = arith.constant 1 : index
    %c0_152 = arith.constant 0 : index
    %c0_153 = arith.constant 0 : index
    %118 = vector.load %arg13[%c1_151, %c0_152, %c0_153] : memref<2x16x32xf32, #tpu.memory_space<vmem>>, vector<1x16x32xf32>
    %119 = vector.shape_cast %118 : vector<1x16x32xf32> to vector<16x32xf32>
    %120 = vector.shape_cast %117 : vector<16x32xf32> to vector<1x16x32xf32>
    tpu.vector_store %arg13[%c1_151, %c0_152, %c0_153], %120 {strides = array<i32>} : memref<2x16x32xf32, #tpu.memory_space<vmem>>, vector<1x16x32xf32>,
    %121 = vector.extract_strided_slice %109 {offsets = [0, 0], sizes = [8, 32], strides = [1, 1]} : vector<16x32xf32> to vector<8x32xf32>
    %cst_154 = arith.constant 0.000000e+00 : f32
    %122 = vector.broadcast %cst_154 : f32 to vector<8x32xf32>
    %123 = arith.maximumf %121, %122 : vector<8x32xf32>
    %124 = arith.truncf %123 : vector<8x32xf32> to vector<8x32xbf16>
    %c1_155 = arith.constant 1 : index
    %c0_156 = arith.constant 0 : index
    %c8_157 = arith.constant 8 : index
    %c0_158 = arith.constant 0 : index
    %125 = vector.load %arg11[%c1_155, %c0_156, %c8_157, %c0_158] : memref<2x2x24x32xbf16, #tpu.memory_space<vmem>>, vector<1x1x8x32xbf16>
    %126 = vector.shape_cast %125 : vector<1x1x8x32xbf16> to vector<8x32xbf16>
    %127 = vector.shape_cast %124 : vector<8x32xbf16> to vector<1x1x8x32xbf16>
    tpu.vector_store %arg11[%c1_155, %c0_156, %c8_157, %c0_158], %127 {strides = array<i32>} : memref<2x2x24x32xbf16, #tpu.memory_space<vmem>>, vector<1x1x8x32xbf16>,
    %128 = vector.extract_strided_slice %109 {offsets = [8, 0], sizes = [8, 32], strides = [1, 1]} : vector<16x32xf32> to vector<8x32xf32>
    %cst_159 = arith.constant 0.000000e+00 : f32
    %129 = vector.broadcast %cst_159 : f32 to vector<8x32xf32>
    %130 = arith.maximumf %128, %129 : vector<8x32xf32>
    %131 = arith.truncf %130 : vector<8x32xf32> to vector<8x32xbf16>
    %c1_160 = arith.constant 1 : index
    %c1_161 = arith.constant 1 : index
    %c8_162 = arith.constant 8 : index
    %c0_163 = arith.constant 0 : index
    %132 = vector.load %arg11[%c1_160, %c1_161, %c8_162, %c0_163] : memref<2x2x24x32xbf16, #tpu.memory_space<vmem>>, vector<1x1x8x32xbf16>
    %133 = vector.shape_cast %132 : vector<1x1x8x32xbf16> to vector<8x32xbf16>
    %134 = vector.shape_cast %131 : vector<8x32xbf16> to vector<1x1x8x32xbf16>
    tpu.vector_store %arg11[%c1_160, %c1_161, %c8_162, %c0_163], %134 {strides = array<i32>} : memref<2x2x24x32xbf16, #tpu.memory_space<vmem>>, vector<1x1x8x32xbf16>,
    %c1_164 = arith.constant 1 : index
    %c0_165 = arith.constant 0 : index
    %c0_166 = arith.constant 0 : index
    %c0_167 = arith.constant 0 : index
    %135 = vector.load %arg11[%c1_164, %c0_165, %c0_166, %c0_167] : memref<2x2x24x32xbf16, #tpu.memory_space<vmem>>, vector<1x1x8x32xbf16>
    %136 = vector.shape_cast %135 : vector<1x1x8x32xbf16> to vector<8x32xbf16>
    %c0_168 = arith.constant 0 : index
    %c0_169 = arith.constant 0 : index
    %137 = vector.load %arg12[%c0_168, %c0_169] : memref<16x288xbf16, #tpu.memory_space<vmem>>, vector<8x32xbf16>
    tpu.vector_store %arg12[%c0_168, %c0_169], %136 {strides = array<i32>} : memref<16x288xbf16, #tpu.memory_space<vmem>>, vector<8x32xbf16>,
    %c1_170 = arith.constant 1 : index
    %c1_171 = arith.constant 1 : index
    %c0_172 = arith.constant 0 : index
    %c0_173 = arith.constant 0 : index
    %138 = vector.load %arg11[%c1_170, %c1_171, %c0_172, %c0_173] : memref<2x2x24x32xbf16, #tpu.memory_space<vmem>>, vector<1x1x8x32xbf16>
    %139 = vector.shape_cast %138 : vector<1x1x8x32xbf16> to vector<8x32xbf16>
    %c8_174 = arith.constant 8 : index
    %c0_175 = arith.constant 0 : index
    %140 = vector.load %arg12[%c8_174, %c0_175] : memref<16x288xbf16, #tpu.memory_space<vmem>>, vector<8x32xbf16>
    tpu.vector_store %arg12[%c8_174, %c0_175], %139 {strides = array<i32>} : memref<16x288xbf16, #tpu.memory_space<vmem>>, vector<8x32xbf16>,
    %c1_176 = arith.constant 1 : index
    %c0_177 = arith.constant 0 : index
    %c2_178 = arith.constant 2 : index
    %c0_179 = arith.constant 0 : index
    %141 = vector.load %arg11[%c1_176, %c0_177, %c2_178, %c0_179] : memref<2x2x24x32xbf16, #tpu.memory_space<vmem>>, vector<1x1x8x32xbf16>
    %142 = vector.shape_cast %141 : vector<1x1x8x32xbf16> to vector<8x32xbf16>
    %c0_180 = arith.constant 0 : index
    %c32_181 = arith.constant 32 : index
    %143 = vector.load %arg12[%c0_180, %c32_181] : memref<16x288xbf16, #tpu.memory_space<vmem>>, vector<8x32xbf16>
    tpu.vector_store %arg12[%c0_180, %c32_181], %142 {strides = array<i32>} : memref<16x288xbf16, #tpu.memory_space<vmem>>, vector<8x32xbf16>,
    %c1_182 = arith.constant 1 : index
    %c1_183 = arith.constant 1 : index
    %c2_184 = arith.constant 2 : index
    %c0_185 = arith.constant 0 : index
    %144 = vector.load %arg11[%c1_182, %c1_183, %c2_184, %c0_185] : memref<2x2x24x32xbf16, #tpu.memory_space<vmem>>, vector<1x1x8x32xbf16>
    %145 = vector.shape_cast %144 : vector<1x1x8x32xbf16> to vector<8x32xbf16>
    %c8_186 = arith.constant 8 : index
    %c32_187 = arith.constant 32 : index
    %146 = vector.load %arg12[%c8_186, %c32_187] : memref<16x288xbf16, #tpu.memory_space<vmem>>, vector<8x32xbf16>
    tpu.vector_store %arg12[%c8_186, %c32_187], %145 {strides = array<i32>} : memref<16x288xbf16, #tpu.memory_space<vmem>>, vector<8x32xbf16>,
    %c1_188 = arith.constant 1 : index
    %c0_189 = arith.constant 0 : index
    %c4_190 = arith.constant 4 : index
    %c0_191 = arith.constant 0 : index
    %147 = vector.load %arg11[%c1_188, %c0_189, %c4_190, %c0_191] : memref<2x2x24x32xbf16, #tpu.memory_space<vmem>>, vector<1x1x8x32xbf16>
    %148 = vector.shape_cast %147 : vector<1x1x8x32xbf16> to vector<8x32xbf16>
    %c0_192 = arith.constant 0 : index
    %c64_193 = arith.constant 64 : index
    %149 = vector.load %arg12[%c0_192, %c64_193] : memref<16x288xbf16, #tpu.memory_space<vmem>>, vector<8x32xbf16>
    tpu.vector_store %arg12[%c0_192, %c64_193], %148 {strides = array<i32>} : memref<16x288xbf16, #tpu.memory_space<vmem>>, vector<8x32xbf16>,
    %c1_194 = arith.constant 1 : index
    %c1_195 = arith.constant 1 : index
    %c4_196 = arith.constant 4 : index
    %c0_197 = arith.constant 0 : index
    %150 = vector.load %arg11[%c1_194, %c1_195, %c4_196, %c0_197] : memref<2x2x24x32xbf16, #tpu.memory_space<vmem>>, vector<1x1x8x32xbf16>
    %151 = vector.shape_cast %150 : vector<1x1x8x32xbf16> to vector<8x32xbf16>
    %c8_198 = arith.constant 8 : index
    %c64_199 = arith.constant 64 : index
    %152 = vector.load %arg12[%c8_198, %c64_199] : memref<16x288xbf16, #tpu.memory_space<vmem>>, vector<8x32xbf16>
    tpu.vector_store %arg12[%c8_198, %c64_199], %151 {strides = array<i32>} : memref<16x288xbf16, #tpu.memory_space<vmem>>, vector<8x32xbf16>,
    %c1_200 = arith.constant 1 : index
    %c0_201 = arith.constant 0 : index
    %c6_202 = arith.constant 6 : index
    %c0_203 = arith.constant 0 : index
    %153 = vector.load %arg11[%c1_200, %c0_201, %c6_202, %c0_203] : memref<2x2x24x32xbf16, #tpu.memory_space<vmem>>, vector<1x1x8x32xbf16>
    %154 = vector.shape_cast %153 : vector<1x1x8x32xbf16> to vector<8x32xbf16>
    %c0_204 = arith.constant 0 : index
    %c96_205 = arith.constant 96 : index
    %155 = vector.load %arg12[%c0_204, %c96_205] : memref<16x288xbf16, #tpu.memory_space<vmem>>, vector<8x32xbf16>
    tpu.vector_store %arg12[%c0_204, %c96_205], %154 {strides = array<i32>} : memref<16x288xbf16, #tpu.memory_space<vmem>>, vector<8x32xbf16>,
    %c1_206 = arith.constant 1 : index
    %c1_207 = arith.constant 1 : index
    %c6_208 = arith.constant 6 : index
    %c0_209 = arith.constant 0 : index
    %156 = vector.load %arg11[%c1_206, %c1_207, %c6_208, %c0_209] : memref<2x2x24x32xbf16, #tpu.memory_space<vmem>>, vector<1x1x8x32xbf16>
    %157 = vector.shape_cast %156 : vector<1x1x8x32xbf16> to vector<8x32xbf16>
    %c8_210 = arith.constant 8 : index
    %c96_211 = arith.constant 96 : index
    %158 = vector.load %arg12[%c8_210, %c96_211] : memref<16x288xbf16, #tpu.memory_space<vmem>>, vector<8x32xbf16>
    tpu.vector_store %arg12[%c8_210, %c96_211], %157 {strides = array<i32>} : memref<16x288xbf16, #tpu.memory_space<vmem>>, vector<8x32xbf16>,
    %c1_212 = arith.constant 1 : index
    %c0_213 = arith.constant 0 : index
    %c7_214 = arith.constant 7 : index
    %c0_215 = arith.constant 0 : index
    %159 = vector.load %arg11[%c1_212, %c0_213, %c7_214, %c0_215] : memref<2x2x24x32xbf16, #tpu.memory_space<vmem>>, vector<1x1x8x32xbf16>
    %160 = vector.shape_cast %159 : vector<1x1x8x32xbf16> to vector<8x32xbf16>
    %c0_216 = arith.constant 0 : index
    %c128_217 = arith.constant 128 : index
    %161 = vector.load %arg12[%c0_216, %c128_217] : memref<16x288xbf16, #tpu.memory_space<vmem>>, vector<8x32xbf16>
    tpu.vector_store %arg12[%c0_216, %c128_217], %160 {strides = array<i32>} : memref<16x288xbf16, #tpu.memory_space<vmem>>, vector<8x32xbf16>,
    %c1_218 = arith.constant 1 : index
    %c1_219 = arith.constant 1 : index
    %c7_220 = arith.constant 7 : index
    %c0_221 = arith.constant 0 : index
    %162 = vector.load %arg11[%c1_218, %c1_219, %c7_220, %c0_221] : memref<2x2x24x32xbf16, #tpu.memory_space<vmem>>, vector<1x1x8x32xbf16>
    %163 = vector.shape_cast %162 : vector<1x1x8x32xbf16> to vector<8x32xbf16>
    %c8_222 = arith.constant 8 : index
    %c128_223 = arith.constant 128 : index
    %164 = vector.load %arg12[%c8_222, %c128_223] : memref<16x288xbf16, #tpu.memory_space<vmem>>, vector<8x32xbf16>
    tpu.vector_store %arg12[%c8_222, %c128_223], %163 {strides = array<i32>} : memref<16x288xbf16, #tpu.memory_space<vmem>>, vector<8x32xbf16>,
    %c1_224 = arith.constant 1 : index
    %c0_225 = arith.constant 0 : index
    %c8_226 = arith.constant 8 : index
    %c0_227 = arith.constant 0 : index
    %165 = vector.load %arg11[%c1_224, %c0_225, %c8_226, %c0_227] : memref<2x2x24x32xbf16, #tpu.memory_space<vmem>>, vector<1x1x8x32xbf16>
    %166 = vector.shape_cast %165 : vector<1x1x8x32xbf16> to vector<8x32xbf16>
    %c0_228 = arith.constant 0 : index
    %c160_229 = arith.constant 160 : index
    %167 = vector.load %arg12[%c0_228, %c160_229] : memref<16x288xbf16, #tpu.memory_space<vmem>>, vector<8x32xbf16>
    tpu.vector_store %arg12[%c0_228, %c160_229], %166 {strides = array<i32>} : memref<16x288xbf16, #tpu.memory_space<vmem>>, vector<8x32xbf16>,
    %c1_230 = arith.constant 1 : index
    %c1_231 = arith.constant 1 : index
    %c8_232 = arith.constant 8 : index
    %c0_233 = arith.constant 0 : index
    %168 = vector.load %arg11[%c1_230, %c1_231, %c8_232, %c0_233] : memref<2x2x24x32xbf16, #tpu.memory_space<vmem>>, vector<1x1x8x32xbf16>
    %169 = vector.shape_cast %168 : vector<1x1x8x32xbf16> to vector<8x32xbf16>
    %c8_234 = arith.constant 8 : index
    %c160_235 = arith.constant 160 : index
    %170 = vector.load %arg12[%c8_234, %c160_235] : memref<16x288xbf16, #tpu.memory_space<vmem>>, vector<8x32xbf16>
    tpu.vector_store %arg12[%c8_234, %c160_235], %169 {strides = array<i32>} : memref<16x288xbf16, #tpu.memory_space<vmem>>, vector<8x32xbf16>,
    %c1_236 = arith.constant 1 : index
    %c0_237 = arith.constant 0 : index
    %c9_238 = arith.constant 9 : index
    %c0_239 = arith.constant 0 : index
    %171 = vector.load %arg11[%c1_236, %c0_237, %c9_238, %c0_239] : memref<2x2x24x32xbf16, #tpu.memory_space<vmem>>, vector<1x1x8x32xbf16>
    %172 = vector.shape_cast %171 : vector<1x1x8x32xbf16> to vector<8x32xbf16>
    %c0_240 = arith.constant 0 : index
    %c192_241 = arith.constant 192 : index
    %173 = vector.load %arg12[%c0_240, %c192_241] : memref<16x288xbf16, #tpu.memory_space<vmem>>, vector<8x32xbf16>
    tpu.vector_store %arg12[%c0_240, %c192_241], %172 {strides = array<i32>} : memref<16x288xbf16, #tpu.memory_space<vmem>>, vector<8x32xbf16>,
    %c1_242 = arith.constant 1 : index
    %c1_243 = arith.constant 1 : index
    %c9_244 = arith.constant 9 : index
    %c0_245 = arith.constant 0 : index
    %174 = vector.load %arg11[%c1_242, %c1_243, %c9_244, %c0_245] : memref<2x2x24x32xbf16, #tpu.memory_space<vmem>>, vector<1x1x8x32xbf16>
    %175 = vector.shape_cast %174 : vector<1x1x8x32xbf16> to vector<8x32xbf16>
    %c8_246 = arith.constant 8 : index
    %c192_247 = arith.constant 192 : index
    %176 = vector.load %arg12[%c8_246, %c192_247] : memref<16x288xbf16, #tpu.memory_space<vmem>>, vector<8x32xbf16>
    tpu.vector_store %arg12[%c8_246, %c192_247], %175 {strides = array<i32>} : memref<16x288xbf16, #tpu.memory_space<vmem>>, vector<8x32xbf16>,
    %c1_248 = arith.constant 1 : index
    %c0_249 = arith.constant 0 : index
    %c10_250 = arith.constant 10 : index
    %c0_251 = arith.constant 0 : index
    %177 = vector.load %arg11[%c1_248, %c0_249, %c10_250, %c0_251] : memref<2x2x24x32xbf16, #tpu.memory_space<vmem>>, vector<1x1x8x32xbf16>
    %178 = vector.shape_cast %177 : vector<1x1x8x32xbf16> to vector<8x32xbf16>
    %c0_252 = arith.constant 0 : index
    %c224_253 = arith.constant 224 : index
    %179 = vector.load %arg12[%c0_252, %c224_253] : memref<16x288xbf16, #tpu.memory_space<vmem>>, vector<8x32xbf16>
    tpu.vector_store %arg12[%c0_252, %c224_253], %178 {strides = array<i32>} : memref<16x288xbf16, #tpu.memory_space<vmem>>, vector<8x32xbf16>,
    %c1_254 = arith.constant 1 : index
    %c1_255 = arith.constant 1 : index
    %c10_256 = arith.constant 10 : index
    %c0_257 = arith.constant 0 : index
    %180 = vector.load %arg11[%c1_254, %c1_255, %c10_256, %c0_257] : memref<2x2x24x32xbf16, #tpu.memory_space<vmem>>, vector<1x1x8x32xbf16>
    %181 = vector.shape_cast %180 : vector<1x1x8x32xbf16> to vector<8x32xbf16>
    %c8_258 = arith.constant 8 : index
    %c224_259 = arith.constant 224 : index
    %182 = vector.load %arg12[%c8_258, %c224_259] : memref<16x288xbf16, #tpu.memory_space<vmem>>, vector<8x32xbf16>
    tpu.vector_store %arg12[%c8_258, %c224_259], %181 {strides = array<i32>} : memref<16x288xbf16, #tpu.memory_space<vmem>>, vector<8x32xbf16>,
    %c1_260 = arith.constant 1 : index
    %c0_261 = arith.constant 0 : index
    %c12_262 = arith.constant 12 : index
    %c0_263 = arith.constant 0 : index
    %183 = vector.load %arg11[%c1_260, %c0_261, %c12_262, %c0_263] : memref<2x2x24x32xbf16, #tpu.memory_space<vmem>>, vector<1x1x8x32xbf16>
    %184 = vector.shape_cast %183 : vector<1x1x8x32xbf16> to vector<8x32xbf16>
    %c0_264 = arith.constant 0 : index
    %c256_265 = arith.constant 256 : index
    %185 = vector.load %arg12[%c0_264, %c256_265] : memref<16x288xbf16, #tpu.memory_space<vmem>>, vector<8x32xbf16>
    tpu.vector_store %arg12[%c0_264, %c256_265], %184 {strides = array<i32>} : memref<16x288xbf16, #tpu.memory_space<vmem>>, vector<8x32xbf16>,
    %c1_266 = arith.constant 1 : index
    %c1_267 = arith.constant 1 : index
    %c12_268 = arith.constant 12 : index
    %c0_269 = arith.constant 0 : index
    %186 = vector.load %arg11[%c1_266, %c1_267, %c12_268, %c0_269] : memref<2x2x24x32xbf16, #tpu.memory_space<vmem>>, vector<1x1x8x32xbf16>
    %187 = vector.shape_cast %186 : vector<1x1x8x32xbf16> to vector<8x32xbf16>
    %c8_270 = arith.constant 8 : index
    %c256_271 = arith.constant 256 : index
    %188 = vector.load %arg12[%c8_270, %c256_271] : memref<16x288xbf16, #tpu.memory_space<vmem>>, vector<8x32xbf16>
    tpu.vector_store %arg12[%c8_270, %c256_271], %187 {strides = array<i32>} : memref<16x288xbf16, #tpu.memory_space<vmem>>, vector<8x32xbf16>,
    %c0_272 = arith.constant 0 : index
    %c0_273 = arith.constant 0 : index
    %189 = vector.load %arg12[%c0_272, %c0_273] : memref<16x288xbf16, #tpu.memory_space<vmem>>, vector<16x288xbf16>
    %c0_274 = arith.constant 0 : index
    %c0_275 = arith.constant 0 : index
    %190 = vector.load %arg3[%c0_274, %c0_275] : memref<288x32xbf16, #tpu.memory_space<vmem>>, vector<288x32xbf16>
    %cst_276 = arith.constant dense<0.000000e+00> : vector<16x32xf32>
    %191 = tpu.matmul %189, %190, %cst_276 {dimension_numbers = #tpu.dot_dimension_numbers<[1], [0], [0], [1], [0, 0, 1, 1], [], []>} : vector<16x288xbf16>, vector<288x32xbf16>, vector<16x32xf32> -> vector<16x32xf32>
    %c0_277 = arith.constant 0 : index
    %c0_278 = arith.constant 0 : index
    %192 = vector.load %arg5[%c0_277, %c0_278] : memref<1x32xf32, #tpu.memory_space<vmem>>, vector<1x32xf32>
    %193 = vector.broadcast %192 : vector<1x32xf32> to vector<16x32xf32>
    %194 = arith.addf %191, %193 : vector<16x32xf32>
    %195 = vector.extract_strided_slice %189 {offsets = [0, 128], sizes = [16, 32], strides = [1, 1]} : vector<16x288xbf16> to vector<16x32xbf16>
    %196 = vector.extract_strided_slice %189 {offsets = [0, 160], sizes = [16, 32], strides = [1, 1]} : vector<16x288xbf16> to vector<16x32xbf16>
    %197 = arith.maximumf %195, %196 : vector<16x32xbf16>
    %198 = vector.extract_strided_slice %189 {offsets = [0, 192], sizes = [16, 32], strides = [1, 1]} : vector<16x288xbf16> to vector<16x32xbf16>
    %199 = arith.maximumf %197, %198 : vector<16x32xbf16>
    %200 = arith.extf %199 : vector<16x32xbf16> to vector<16x32xf32>
    %c1_279 = arith.constant 1 : index
    %c1_280 = arith.constant 1 : index
    %201 = memref.load %arg6[%c1_279, %c1_280] : memref<2x2xf32, #tpu.memory_space<smem>>
    %202 = vector.broadcast %201 : f32 to vector<16x32xf32>
    %203 = arith.mulf %202, %200 : vector<16x32xf32>
    %204 = arith.addf %194, %203 : vector<16x32xf32>
    %c1_281 = arith.constant 1 : index
    %c0_282 = arith.constant 0 : index
    %c0_283 = arith.constant 0 : index
    %205 = vector.load %arg13[%c1_281, %c0_282, %c0_283] : memref<2x16x32xf32, #tpu.memory_space<vmem>>, vector<1x16x32xf32>
    %206 = vector.shape_cast %205 : vector<1x16x32xf32> to vector<16x32xf32>
    %207 = arith.addf %206, %204 : vector<16x32xf32>
    %c1_284 = arith.constant 1 : index
    %c0_285 = arith.constant 0 : index
    %c0_286 = arith.constant 0 : index
    %208 = vector.load %arg13[%c1_284, %c0_285, %c0_286] : memref<2x16x32xf32, #tpu.memory_space<vmem>>, vector<1x16x32xf32>
    %209 = vector.shape_cast %208 : vector<1x16x32xf32> to vector<16x32xf32>
    %210 = vector.shape_cast %207 : vector<16x32xf32> to vector<1x16x32xf32>
    tpu.vector_store %arg13[%c1_284, %c0_285, %c0_286], %210 {strides = array<i32>} : memref<2x16x32xf32, #tpu.memory_space<vmem>>, vector<1x16x32xf32>,
    %c0_287 = arith.constant 0 : index
    %211 = memref.load %arg7[%c0_287] : memref<2xf32, #tpu.memory_space<smem>>
    %c0_288 = arith.constant 0 : index
    %c0_289 = arith.constant 0 : index
    %c0_290 = arith.constant 0 : index
    %212 = vector.load %arg13[%c0_288, %c0_289, %c0_290] : memref<2x16x32xf32, #tpu.memory_space<vmem>>, vector<1x16x32xf32>
    %213 = vector.shape_cast %212 : vector<1x16x32xf32> to vector<16x32xf32>
    %214 = vector.broadcast %211 : f32 to vector<16x32xf32>
    %215 = arith.mulf %214, %213 : vector<16x32xf32>
    %c1_291 = arith.constant 1 : index
    %216 = memref.load %arg7[%c1_291] : memref<2xf32, #tpu.memory_space<smem>>
    %c1_292 = arith.constant 1 : index
    %c0_293 = arith.constant 0 : index
    %c0_294 = arith.constant 0 : index
    %217 = vector.load %arg13[%c1_292, %c0_293, %c0_294] : memref<2x16x32xf32, #tpu.memory_space<vmem>>, vector<1x16x32xf32>
    %218 = vector.shape_cast %217 : vector<1x16x32xf32> to vector<16x32xf32>
    %219 = vector.broadcast %216 : f32 to vector<16x32xf32>
    %220 = arith.mulf %219, %218 : vector<16x32xf32>
    %221 = arith.addf %215, %220 : vector<16x32xf32>
    %cst_295 = arith.constant dense<0.000000e+00> : vector<16xf32>
    %222 = vector.multi_reduction <add>, %221, %cst_295 [1] : vector<16x32xf32> to vector<16xf32>
    %223 = vector.shape_cast %222 : vector<16xf32> to vector<16x1xf32>
    %cst_296 = arith.constant 3.200000e+01 : f32
    %224 = vector.broadcast %cst_296 : f32 to vector<16x1xf32>
    %225 = arith.divf %223, %224 : vector<16x1xf32>
    %226 = arith.mulf %221, %221 : vector<16x32xf32>
    %cst_297 = arith.constant dense<0.000000e+00> : vector<16xf32>
    %227 = vector.multi_reduction <add>, %226, %cst_297 [1] : vector<16x32xf32> to vector<16xf32>
    %228 = vector.shape_cast %227 : vector<16xf32> to vector<16x1xf32>
    %cst_298 = arith.constant 3.200000e+01 : f32
    %229 = vector.broadcast %cst_298 : f32 to vector<16x1xf32>
    %230 = arith.divf %228, %229 : vector<16x1xf32>
    %231 = arith.mulf %225, %225 : vector<16x1xf32>
    %232 = arith.subf %230, %231 : vector<16x1xf32>
    %233 = vector.broadcast %225 : vector<16x1xf32> to vector<16x32xf32>
    %234 = arith.subf %221, %233 : vector<16x32xf32>
    %cst_299 = arith.constant 9.99999993E-9 : f32
    %235 = vector.broadcast %cst_299 : f32 to vector<16x1xf32>
    %236 = arith.addf %232, %235 : vector<16x1xf32>
    %237 = math.rsqrt %236 : vector<16x1xf32>
    %238 = vector.broadcast %237 : vector<16x1xf32> to vector<16x32xf32>
    %239 = arith.mulf %234, %238 : vector<16x32xf32>
    %c0_300 = arith.constant 0 : index
    %c0_301 = arith.constant 0 : index
    %240 = vector.load %arg8[%c0_300, %c0_301] : memref<1x32xf32, #tpu.memory_space<vmem>>, vector<1x32xf32>
    %241 = vector.broadcast %240 : vector<1x32xf32> to vector<16x32xf32>
    %242 = arith.mulf %239, %241 : vector<16x32xf32>
    %c0_302 = arith.constant 0 : index
    %c0_303 = arith.constant 0 : index
    %243 = vector.load %arg9[%c0_302, %c0_303] : memref<1x32xf32, #tpu.memory_space<vmem>>, vector<1x32xf32>
    %244 = vector.broadcast %243 : vector<1x32xf32> to vector<16x32xf32>
    %245 = arith.addf %242, %244 : vector<16x32xf32>
    %cst_304 = arith.constant 0.000000e+00 : f32
    %246 = vector.broadcast %cst_304 : f32 to vector<16x32xf32>
    %247 = arith.maximumf %245, %246 : vector<16x32xf32>
    %248 = vector.extract_strided_slice %247 {offsets = [0, 0], sizes = [8, 32], strides = [1, 1]} : vector<16x32xf32> to vector<8x32xf32>
    %c0_305 = arith.constant 0 : index
    %c0_306 = arith.constant 0 : index
    %c0_307 = arith.constant 0 : index
    %249 = vector.load %arg1[%c0_305, %c0_306, %c0_307] : memref<2x8x32xbf16, #tpu.memory_space<vmem>>, vector<1x8x32xbf16>
    %250 = vector.shape_cast %249 : vector<1x8x32xbf16> to vector<8x32xbf16>
    %251 = arith.extf %250 : vector<8x32xbf16> to vector<8x32xf32>
    %252 = arith.addf %248, %251 : vector<8x32xf32>
    %253 = arith.truncf %252 : vector<8x32xf32> to vector<8x32xbf16>
    %c0_308 = arith.constant 0 : index
    %c0_309 = arith.constant 0 : index
    %c0_310 = arith.constant 0 : index
    %254 = vector.load %arg10[%c0_308, %c0_309, %c0_310] : memref<2x8x32xbf16, #tpu.memory_space<vmem>>, vector<1x8x32xbf16>
    %255 = vector.shape_cast %254 : vector<1x8x32xbf16> to vector<8x32xbf16>
    %256 = vector.shape_cast %253 : vector<8x32xbf16> to vector<1x8x32xbf16>
    tpu.vector_store %arg10[%c0_308, %c0_309, %c0_310], %256 {strides = array<i32>} : memref<2x8x32xbf16, #tpu.memory_space<vmem>>, vector<1x8x32xbf16>,
    %257 = vector.extract_strided_slice %247 {offsets = [8, 0], sizes = [8, 32], strides = [1, 1]} : vector<16x32xf32> to vector<8x32xf32>
    %c1_311 = arith.constant 1 : index
    %c0_312 = arith.constant 0 : index
    %c0_313 = arith.constant 0 : index
    %258 = vector.load %arg1[%c1_311, %c0_312, %c0_313] : memref<2x8x32xbf16, #tpu.memory_space<vmem>>, vector<1x8x32xbf16>
    %259 = vector.shape_cast %258 : vector<1x8x32xbf16> to vector<8x32xbf16>
    %260 = arith.extf %259 : vector<8x32xbf16> to vector<8x32xf32>
    %261 = arith.addf %257, %260 : vector<8x32xf32>
    %262 = arith.truncf %261 : vector<8x32xf32> to vector<8x32xbf16>
    %c1_314 = arith.constant 1 : index
    %c0_315 = arith.constant 0 : index
    %c0_316 = arith.constant 0 : index
    %263 = vector.load %arg10[%c1_314, %c0_315, %c0_316] : memref<2x8x32xbf16, #tpu.memory_space<vmem>>, vector<1x8x32xbf16>
    %264 = vector.shape_cast %263 : vector<1x8x32xbf16> to vector<8x32xbf16>
    %265 = vector.shape_cast %262 : vector<8x32xbf16> to vector<1x8x32xbf16>
    tpu.vector_store %arg10[%c1_314, %c0_315, %c0_316], %265 {strides = array<i32>} : memref<2x8x32xbf16, #tpu.memory_space<vmem>>, vector<1x8x32xbf16>,
    return
  }
  func.func @transform_0(%arg0: i32) -> (i32, i32, i32) {
    %c0_i32 = arith.constant 0 : i32
    %c0_i32_0 = arith.constant 0 : i32
    %c0_i32_1 = arith.constant 0 : i32
    return %arg0, %c0_i32, %c0_i32_0 : i32, i32, i32
  }
  func.func @transform_1(%arg0: i32) -> (i32, i32) {
    %c0_i32 = arith.constant 0 : i32
    %c0_i32_0 = arith.constant 0 : i32
    %c0_i32_1 = arith.constant 0 : i32
    return %c0_i32, %c0_i32_0 : i32, i32
  }
  func.func @transform_2(%arg0: i32) -> (i32, i32) {
    %c0_i32 = arith.constant 0 : i32
    %c0_i32_0 = arith.constant 0 : i32
    %c0_i32_1 = arith.constant 0 : i32
    return %c0_i32, %c0_i32_0 : i32, i32
  }
  func.func @transform_3(%arg0: i32) -> (i32, i32) {
    %c0_i32 = arith.constant 0 : i32
    %c0_i32_0 = arith.constant 0 : i32
    %c0_i32_1 = arith.constant 0 : i32
    return %c0_i32, %c0_i32_0 : i32, i32
  }
  func.func @transform_4(%arg0: i32) -> (i32, i32) {
    %c0_i32 = arith.constant 0 : i32
    %c0_i32_0 = arith.constant 0 : i32
    %c0_i32_1 = arith.constant 0 : i32
    return %c0_i32, %c0_i32_0 : i32, i32
  }
  func.func @transform_5(%arg0: i32) -> (i32, i32) {
    %c0_i32 = arith.constant 0 : i32
    %c0_i32_0 = arith.constant 0 : i32
    %c0_i32_1 = arith.constant 0 : i32
    return %c0_i32, %c0_i32_0 : i32, i32
  }
  func.func @transform_6(%arg0: i32) -> i32 {
    %c0_i32 = arith.constant 0 : i32
    %c0_i32_0 = arith.constant 0 : i32
    return %c0_i32 : i32
  }
  func.func @transform_7(%arg0: i32) -> (i32, i32) {
    %c0_i32 = arith.constant 0 : i32
    %c0_i32_0 = arith.constant 0 : i32
    %c0_i32_1 = arith.constant 0 : i32
    return %c0_i32, %c0_i32_0 : i32, i32
  }
  func.func @transform_8(%arg0: i32) -> (i32, i32) {
    %c0_i32 = arith.constant 0 : i32
    %c0_i32_0 = arith.constant 0 : i32
    %c0_i32_1 = arith.constant 0 : i32
    return %c0_i32, %c0_i32_0 : i32, i32
  }
  func.func @transform_9(%arg0: i32) -> (i32, i32, i32) {
    %c0_i32 = arith.constant 0 : i32
    %c0_i32_0 = arith.constant 0 : i32
    %c0_i32_1 = arith.constant 0 : i32
    return %arg0, %c0_i32, %c0_i32_0 : i32, i32, i32
  }
}

module attributes {stable_mosaic.version = 11 : i64} {
  func.func @linear_kernel(%arg0: i32, %arg1: memref<32x32xbf16, #tpu.memory_space<vmem>>, %arg2: memref<32x64xbf16, #tpu.memory_space<vmem>>, %arg3: memref<1x64xf32, #tpu.memory_space<vmem>>, %arg4: memref<32x64xf32, #tpu.memory_space<vmem>>) attributes {dimension_semantics = [#tpu.dimension_semantics<parallel>], iteration_bounds = array<i64: 1>, scalar_prefetch = 0 : i64, scratch_operands = 0 : i64, tpu.core_type = #tpu.core_type<tc>, window_params = [{transform_indices = @transform_0, window_bounds = array<i64: 32, 32>}, {pipeline_mode = #tpu.pipeline_mode<synchronous>, transform_indices = @transform_1, window_bounds = array<i64: 32, 64>}, {pipeline_mode = #tpu.pipeline_mode<synchronous>, transform_indices = @transform_2, window_bounds = array<i64: 1, 64>}, {transform_indices = @transform_3, window_bounds = array<i64: 32, 64>}]} {
    %c0 = arith.constant 0 : index
    %c0_0 = arith.constant 0 : index
    %0 = vector.load %arg1[%c0, %c0_0] : memref<32x32xbf16, #tpu.memory_space<vmem>>, vector<32x32xbf16>
    %c0_1 = arith.constant 0 : index
    %c0_2 = arith.constant 0 : index
    %1 = vector.load %arg2[%c0_1, %c0_2] : memref<32x64xbf16, #tpu.memory_space<vmem>>, vector<32x64xbf16>
    %cst = arith.constant dense<0.000000e+00> : vector<32x64xf32>
    %2 = tpu.matmul %0, %1, %cst {dimension_numbers = #tpu.dot_dimension_numbers<[1], [0], [0], [1], [0, 0, 1, 1], [], []>} : vector<32x32xbf16>, vector<32x64xbf16>, vector<32x64xf32> -> vector<32x64xf32>
    %c0_3 = arith.constant 0 : index
    %c0_4 = arith.constant 0 : index
    %3 = vector.load %arg3[%c0_3, %c0_4] : memref<1x64xf32, #tpu.memory_space<vmem>>, vector<1x64xf32>
    %4 = vector.broadcast %3 : vector<1x64xf32> to vector<32x64xf32>
    %5 = arith.addf %2, %4 : vector<32x64xf32>
    %c0_5 = arith.constant 0 : index
    %c0_6 = arith.constant 0 : index
    %6 = vector.load %arg4[%c0_5, %c0_6] : memref<32x64xf32, #tpu.memory_space<vmem>>, vector<32x64xf32>
    tpu.vector_store %arg4[%c0_5, %c0_6], %5 {strides = array<i32>} : memref<32x64xf32, #tpu.memory_space<vmem>>, vector<32x64xf32>,
    return
  }
  func.func @transform_0(%arg0: i32) -> (i32, i32) {
    %c0_i32 = arith.constant 0 : i32
    %c0_i32_0 = arith.constant 0 : i32
    return %arg0, %c0_i32 : i32, i32
  }
  func.func @transform_1(%arg0: i32) -> (i32, i32) {
    %c0_i32 = arith.constant 0 : i32
    %c0_i32_0 = arith.constant 0 : i32
    %c0_i32_1 = arith.constant 0 : i32
    return %c0_i32, %c0_i32_0 : i32, i32
  }
  func.func @transform_2(%arg0: i32) -> (i32, i32) {
    %c0_i32 = arith.constant 0 : i32
    %c0_i32_0 = arith.constant 0 : i32
    %c0_i32_1 = arith.constant 0 : i32
    return %c0_i32, %c0_i32_0 : i32, i32
  }
  func.func @transform_3(%arg0: i32) -> (i32, i32) {
    %c0_i32 = arith.constant 0 : i32
    %c0_i32_0 = arith.constant 0 : i32
    return %arg0, %c0_i32 : i32, i32
  }
}

module attributes {stable_mosaic.version = 11 : i64} {
  func.func @linear_kernel(%arg0: i32, %arg1: memref<16x32xbf16, #tpu.memory_space<vmem>>, %arg2: memref<32x4xbf16, #tpu.memory_space<vmem>>, %arg3: memref<1x4xf32, #tpu.memory_space<vmem>>, %arg4: memref<16x4xf32, #tpu.memory_space<vmem>>) attributes {dimension_semantics = [#tpu.dimension_semantics<parallel>], iteration_bounds = array<i64: 1>, scalar_prefetch = 0 : i64, scratch_operands = 0 : i64, tpu.core_type = #tpu.core_type<tc>, window_params = [{transform_indices = @transform_0, window_bounds = array<i64: 16, 32>}, {pipeline_mode = #tpu.pipeline_mode<synchronous>, transform_indices = @transform_1, window_bounds = array<i64: 32, 4>}, {pipeline_mode = #tpu.pipeline_mode<synchronous>, transform_indices = @transform_2, window_bounds = array<i64: 1, 4>}, {transform_indices = @transform_3, window_bounds = array<i64: 16, 4>}]} {
    %c0 = arith.constant 0 : index
    %c0_0 = arith.constant 0 : index
    %0 = vector.load %arg1[%c0, %c0_0] : memref<16x32xbf16, #tpu.memory_space<vmem>>, vector<16x32xbf16>
    %c0_1 = arith.constant 0 : index
    %c0_2 = arith.constant 0 : index
    %1 = vector.load %arg2[%c0_1, %c0_2] : memref<32x4xbf16, #tpu.memory_space<vmem>>, vector<32x4xbf16>
    %cst = arith.constant dense<0.000000e+00> : vector<16x4xf32>
    %2 = tpu.matmul %0, %1, %cst {dimension_numbers = #tpu.dot_dimension_numbers<[1], [0], [0], [1], [0, 0, 1, 1], [], []>} : vector<16x32xbf16>, vector<32x4xbf16>, vector<16x4xf32> -> vector<16x4xf32>
    %c0_3 = arith.constant 0 : index
    %c0_4 = arith.constant 0 : index
    %3 = vector.load %arg3[%c0_3, %c0_4] : memref<1x4xf32, #tpu.memory_space<vmem>>, vector<1x4xf32>
    %4 = vector.broadcast %3 : vector<1x4xf32> to vector<16x4xf32>
    %5 = arith.addf %2, %4 : vector<16x4xf32>
    %c0_5 = arith.constant 0 : index
    %c0_6 = arith.constant 0 : index
    %6 = vector.load %arg4[%c0_5, %c0_6] : memref<16x4xf32, #tpu.memory_space<vmem>>, vector<16x4xf32>
    tpu.vector_store %arg4[%c0_5, %c0_6], %5 {strides = array<i32>} : memref<16x4xf32, #tpu.memory_space<vmem>>, vector<16x4xf32>,
    return
  }
  func.func @transform_0(%arg0: i32) -> (i32, i32) {
    %c0_i32 = arith.constant 0 : i32
    %c0_i32_0 = arith.constant 0 : i32
    return %arg0, %c0_i32 : i32, i32
  }
  func.func @transform_1(%arg0: i32) -> (i32, i32) {
    %c0_i32 = arith.constant 0 : i32
    %c0_i32_0 = arith.constant 0 : i32
    %c0_i32_1 = arith.constant 0 : i32
    return %c0_i32, %c0_i32_0 : i32, i32
  }
  func.func @transform_2(%arg0: i32) -> (i32, i32) {
    %c0_i32 = arith.constant 0 : i32
    %c0_i32_0 = arith.constant 0 : i32
    %c0_i32_1 = arith.constant 0 : i32
    return %c0_i32, %c0_i32_0 : i32, i32
  }
  func.func @transform_3(%arg0: i32) -> (i32, i32) {
    %c0_i32 = arith.constant 0 : i32
    %c0_i32_0 = arith.constant 0 : i32
    return %arg0, %c0_i32 : i32, i32
  }
}

</mosaic_0001>

<bundles_post_ra>
// kernel: search_model_forward.7
= control target key start
LH: loop header
LB: loop body
LE: loop exit
PB: predicated region body
PF: predicated region fallthrough
CT: control target
= control target key end

     0   :  { %s166_s0 = inlined_call_operand.vmem [shape: bf16[16,32], index: 0, kind: input, shape index: {}]   ;;  %s167_s1 = inlined_call_operand.vmem [shape: bf16[32,64], index: 1, kind: input, shape index: {}]   ;;  %s168_s2 = inlined_call_operand.vmem [shape: f32[1,64], index: 2, kind: input, shape index: {}]   ;;  %s169_s3 = inlined_call_operand.hbm [shape: f32[16,64], index: 3, kind: output, shape index: {}]  }
   0x1   :  { %v97_v0 = vld [vmem:[%s167_s1 + $0x8] sm:$0xff] }
   0x2   :  { %8 = vsyncpa [#allocation3], 0  ;;  %53 = vmatpush.bf16.msra.mxu0 %v97_v0  ;;  %v96_v1 = vld [vmem:[%s167_s1] sm:$0xff]  ;;  %vm43_vm0 = vcmask 261120   ;;  %vm61_vm1 = vcmask 523264   ;;  %s128_s20 = smov [#allocation2]  }
   0x3   :  { %v95_v2 = vld [vmem:[%s166_s0] sm:$0xff]  ;;  %s68_s21 = sshll.u32 %s128_s20, 4  ;;  %s70_s1 = sshll.u32 %s169_s3, 4  ;;  %s69_s21 = int_to_ptr.vmem [resolvable:$true] %s68_s21  ;;  %s71_s1 = int_to_ptr.hbm [resolvable:$true] %s70_s1 }
   0x4   :  { %v101_v3 = vld [vmem:[%s168_s2] ss:$0 sm:$0xff]  ;;  %s129_s0 = smov 128   ;;  %s130_s24 = smov 8  }
   0x6   :  { %54 = vmatpush.bf16.msra.mxu0 %v96_v1 }
   0x9   :  { %94 = vmatmul.msk.bf16.vlgmr.msra.gmra.mxu0 %vm43_vm0, %v95_v2 }
  0x86   :  { %v56_v4 = vpop.f32.mrf.mxu0 }
  0x87   :  { %v57_v5 = vadd.f32 %v101_v3, %v56_v4 }
  0x89   :  { %62 = vst.msk [vmem:[#allocation2] sm:$0xff] %vm61_vm1, %v57_v5 }
  0x8e   :  { %v58_v6 = vpop.f32.mrf.mxu0 }
  0x8f   :  { %v59_v7 = vadd.f32 %v101_v3, %v58_v6 }
  0x91   :  { %63 = vst.msk [vmem:[#allocation2 + $0x8] sm:$0xff] %vm61_vm1, %v59_v7 }
  0x92   :  { %76 = dma.vmem_to_hbm [thread:$0]  %s69_s21, 256, %s71_s1, [#allocation3], %s129_s0, %s129_s0, %s130_s24  }
  0x93   :  { %126 = dma.done.wait [#allocation3], 256  }
  0x94   :  { %127 = vsyncadd [#allocation3], 4294967040 }
  0x95   :  { %81 = vsyncpa [#allocation3], 1 }

// kernel: search_model_forward.8
= control target key start
LH: loop header
LB: loop body
LE: loop exit
PB: predicated region body
PF: predicated region fallthrough
CT: control target
= control target key end

     0   :  { %vm49_vm0 = vcmask 261120   ;;  %vm75_vm1 = vcmask 523264   ;;  %s156_s1 = inlined_call_operand.vmem [shape: bf16[32,64], index: 1, kind: input, shape index: {}]   ;;  %s157_s2 = inlined_call_operand.vmem [shape: f32[1,64], index: 2, kind: input, shape index: {}]   ;;  %s158_s0 = inlined_call_operand.vmem [shape: bf16[32,32], index: 0, kind: input, shape index: {}]   ;;  %s159_s3 = inlined_call_operand.vmem [shape: f32[32,64], index: 3, kind: output, shape index: {}]  }
   0x1   :  { %v105_v0 = vld [vmem:[%s156_s1 + $0x8] sm:$0xff]  ;;  %v104_v1 = vld [vmem:[%s156_s1] sm:$0xff] }
   0x2   :  { %62 = vmatpush.bf16.msra.mxu0 %v105_v0  ;;  %106 = vmatpush.bf16.msra.mxu1 %v105_v0  ;;  %v102_v2 = vld [vmem:[%s158_s0] sm:$0xff]  ;;  %v103_v3 = vld [vmem:[%s158_s0 + $0x8] sm:$0xff] }
   0x3   :  { %v108_v4 = vld [vmem:[%s157_s2] ss:$0 sm:$0xff] }
   0x6   :  { %63 = vmatpush.bf16.msra.mxu0 %v104_v1  ;;  %107 = vmatpush.bf16.msra.mxu1 %v104_v1 }
   0x9   :  { %100 = vmatmul.msk.bf16.vlgmr.msra.gmra.mxu0 %vm49_vm0, %v102_v2  ;;  %101 = vmatmul.msk.bf16.vlgmr.msra.gmra.mxu1 %vm49_vm0, %v103_v3 }
  0x86   :  { %v65_v5 = vpop.f32.mrf.mxu0  ;;  %v70_v6 = vpop.f32.mrf.mxu1 }
  0x87   :  { %v66_v7 = vadd.f32 %v108_v4, %v65_v5  ;;  %v71_v8 = vadd.f32 %v108_v4, %v70_v6 }
  0x89   :  { %76 = vst.msk [vmem:[%s159_s3] sm:$0xff] %vm75_vm1, %v66_v7 }
  0x8a   :  { %78 = vst.msk [vmem:[%s159_s3 + $0x10] sm:$0xff] %vm75_vm1, %v71_v8 }
  0x8e   :  { %v67_v9 = vpop.f32.mrf.mxu0  ;;  %v72_v10 = vpop.f32.mrf.mxu1 }
  0x8f   :  { %v68_v11 = vadd.f32 %v108_v4, %v67_v9  ;;  %v73_v12 = vadd.f32 %v108_v4, %v72_v10 }
  0x91   :  { %77 = vst.msk [vmem:[%s159_s3 + $0x8] sm:$0xff] %vm75_vm1, %v68_v11 }
  0x92   :  { %79 = vst.msk [vmem:[%s159_s3 + $0x18] sm:$0xff] %vm75_vm1, %v73_v12 }

// kernel: search_model_forward.9
= control target key start
LH: loop header
LB: loop body
LE: loop exit
PB: predicated region body
PF: predicated region fallthrough
CT: control target
= control target key end

     0   :  { %vm42_vm0 = vcmask 261120   ;;  %vm60_vm1 = vcmask 31744   ;;  %s122_s1 = inlined_call_operand.vmem [shape: bf16[32,4], index: 1, kind: input, shape index: {}]   ;;  %s123_s2 = inlined_call_operand.vmem [shape: f32[1,4], index: 2, kind: input, shape index: {}]   ;;  %s124_s0 = inlined_call_operand.vmem [shape: bf16[16,32], index: 0, kind: input, shape index: {}]   ;;  %s125_s3 = inlined_call_operand.vmem [shape: f32[16,4], index: 3, kind: output, shape index: {}]  }
   0x1   :  { %v82_v0 = vld [vmem:[%s122_s1 + $0x8] sm:$0xff]  ;;  %v81_v1 = vld [vmem:[%s122_s1] sm:$0xff] }
   0x2   :  { %52 = vmatpush.bf16.msra.mxu0 %v82_v0  ;;  %v80_v2 = vld [vmem:[%s124_s0] sm:$0xff] }
   0x3   :  { %v83_v3 = vld [vmem:[%s123_s2] ss:$0 sm:$0xff] }
   0x6   :  { %53 = vmatpush.bf16.msra.mxu0 %v81_v1 }
   0x9   :  { %79 = vmatmul.msk.bf16.vlgmr.msra.gmra.mxu0 %vm42_vm0, %v80_v2 }
  0x86   :  { %v55_v4 = vpop.f32.mrf.mxu0 }
  0x87   :  { %v56_v5 = vadd.f32 %v83_v3, %v55_v4 }
  0x89   :  { %61 = vst.msk [vmem:[%s125_s3] sm:$0xff] %vm60_vm1, %v56_v5 }
  0x8e   :  { %v57_v6 = vpop.f32.mrf.mxu0 }
  0x8f   :  { %v58_v7 = vadd.f32 %v83_v3, %v57_v6 }
  0x91   :  { %62 = vst.msk [vmem:[%s125_s3 + $0x8] sm:$0xff] %vm60_vm1, %v58_v7 }

// kernel: search_model_forward.5
= control target key start
LH: loop header
LB: loop body
LE: loop exit
PB: predicated region body
PF: predicated region fallthrough
CT: control target
= control target key end

     0   :  { %14 = vsyncpa [#allocation6], 0  ;;  %s1856_s0 = inlined_call_operand.vmem [shape: bf16[2,8,32], index: 0, kind: input, shape index: {}]   ;;  %s1857_s1 = inlined_call_operand.vmem [shape: bf16[288,64], index: 1, kind: input, shape index: {}]   ;;  %s1858_s2 = inlined_call_operand.vmem [shape: bf16[288,32], index: 2, kind: input, shape index: {}]   ;;  %s1859_s3 = inlined_call_operand.vmem [shape: f32[1,64], index: 3, kind: input, shape index: {}]   ;;  %s1860_s4 = inlined_call_operand.vmem [shape: f32[1,32], index: 4, kind: input, shape index: {}]   ;;  %s1861_s5 = inlined_call_operand.vmem [shape: f32[2,2], index: 5, kind: input, shape index: {}]   ;;  %s1862_s6 = inlined_call_operand.vmem [shape: f32[2], index: 6, kind: input, shape index: {}]   ;;  %s1863_s7 = inlined_call_operand.vmem [shape: f32[1,32], index: 7, kind: input, shape index: {}]   ;;  %s1864_s8 = inlined_call_operand.vmem [shape: f32[1,32], index: 8, kind: input, shape index: {}]   ;;  %s1865_s9 = inlined_call_operand.vmem [shape: bf16[2,8,32], index: 9, kind: output, shape index: {}]  }
   0x1   :  { %s31_s11 = sshll.u32 %s1861_s5, 4  ;;  %s32_s11 = int_to_ptr.vmem [resolvable:$true] %s31_s11 }
   0x2   :  { %15 = vsyncpa [#allocation8], 0  ;;  %s40_s14 = sshll.u32 %s1862_s6, 4  ;;  %s1450_s15 = smov [#allocation5]   ;;  %s41_s14 = int_to_ptr.vmem [resolvable:$true] %s40_s14 }
   0x3   :  { %34 = dma.vmem_to_smem %s32_s11, 32, %s1450_s15, [#allocation6]  }
   0x4   :  { %s1451_s16 = smov [#allocation7]  }
   0x5   :  { %43 = dma.vmem_to_smem %s41_s14, 16, %s1451_s16, [#allocation8]  }
   0x6   :  { %1446 = dma.done.wait [#allocation6], 32  }
   0x7   :  { %1447 = vsyncadd [#allocation6], 4294967264 }
   0x8   :  { %1448 = dma.done.wait [#allocation8], 16  }
   0x9   :  { %1449 = vsyncadd [#allocation8], 4294967280 }
   0xa   :  { %56 = sfence }
   0xb   :  { %vm58_vm0 = vcmask 257024   ;;  %v1163_v0 = vld [vmem:[%s1856_s0] sm:$0xff]   ;;  %v1452_v3 = vmov 0   ;;  %vm117_vm1 = vcmask 1041408   ;;  %vm118_vm2 = vcmask 1045508   ;;  %s1453_s5 = smov 32  }
   0xc   :  { %v77_v1 = vunpack.c.h.bf16 %v1163_v0  ;;  %v71_v2 = vunpack.c.l.bf16 %v1163_v0  ;;  %59 = vst.msk [vmem:[#allocation2] sm:$0xf] %vm58_vm0, %v1452_v3  ;;  %vm89_vm3 = vcmask 1042432   ;;  %vm90_vm4 = vcmask 1046532   ;;  %vm1530_vm7 = vmor %vm117_vm1, %vm118_vm2  ;;  %v1373_v36 = vld [vmem:[%s1857_s1 + $0x38] sm:$0xff]  ;;  %s1454_s20 = smov 64  }
   0xd   :  { %60 = vst.msk [vmem:[#allocation2 + $0x8] sm:$0xf] %vm58_vm0, %v1452_v3  ;;  %vm145_vm5 = vcmask 1040384   ;;  %vm146_vm6 = vcmask 1044484   ;;  %vm1536_vm8 = vmor %vm89_vm3, %vm90_vm4  ;;  %476 = vmatpush.bf16.msra.mxu0 %v1373_v36  ;;  %s1455_s21 = smov 96   ;;  %vm472_vm1 = vcmask 261120  }
   0xe   :  { %v78_v4 = vmax.f32 %v77_v1, 0.0  ;;  %v72_v5 = vmax.f32 %v71_v2, 0.0  ;;  %63 = vst.msk [vmem:[#allocation2 + $0x14] sm:$0xf] %vm58_vm0, %v1452_v3  ;;  %vm1547_vm9 = vmor %vm145_vm5, %vm146_vm6  ;;  %vm220_vm10 = vsmask.f32 3328 }
   0xf   :  { %69 = vst.msk [vmem:[#allocation2 + $0x2c] sm:$0xf] %vm58_vm0, %v1452_v3  ;;  %vm221_vm11 = vsmask.f32 7440  ;;  %vm171_vm13 = vsmask.f32 256 }
  0x10   :  { %v79_v6 = vpack.c.bf16 %v78_v4, %v78_v4  ;;  %v73_v7 = vpack.c.bf16 %v72_v5, %v72_v5  ;;  %62 = vst.msk [vmem:[#allocation2 + $0xc] sm:$0xf] %vm58_vm0, %v1452_v3  ;;  %vm1573_vm12 = vmor %vm220_vm10, %vm221_vm11  ;;  %vm172_vm14 = vsmask.f32 4368  ;;  %vm99_vm2 = vcmask 519424   ;;  %s1723_s19 = sld [smem:[#allocation5 + $0x1]] }
  0x11   :  { %65 = vst.msk [vmem:[#allocation2 + $0x18] sm:$0xf] %vm58_vm0, %v1452_v3  ;;  %vm1589_vm15 = vmor %vm171_vm13, %vm172_vm14  ;;  %vm127_vm3 = vcmask 781824   ;;  %vm155_vm4 = vcmask 1044224   ;;  %v1393_v25 = vld [vmem:[%s1858_s2 + $0x30] sm:$0xff]  ;;  %s1063_s30 = sld [smem:[#allocation7]] }
  0x12   :  { %80 = vst.msk [vmem:[#allocation2 + $0x10] sm:$0xf] %vm58_vm0, %v79_v6  ;;  %s1360_s10 = sld [smem:[#allocation7 + $0x1]] }
  0x13   :  { %74 = vst.msk [vmem:[#allocation2 + $0x4] sm:$0xf] %vm58_vm0, %v73_v7  ;;  %v113_v10 = vld [vmem:[#allocation2] sm:$0xc] }
  0x14   :  { %66 = vst.msk [vmem:[#allocation2 + $0x20] sm:$0xf] %vm58_vm0, %v1452_v3  ;;  %v286_v8 = vld [vmem:[#allocation2 + $0x8] sm:$0x3]  ;;  %v85_v11 = vld [vmem:[#allocation2] sm:$0xe] }
  0x15   :  { %68 = vst.msk [vmem:[#allocation2 + $0x24] sm:$0xf] %vm58_vm0, %v1452_v3  ;;  %v296_v9 = vld [vmem:[#allocation2 + $0x14] sm:$0x3]  ;;  %v291_v13 = vrot.slane %v286_v8, 6  ;;  %v1166_v20 = vrot.slane %v113_v10, 10 }
  0x16   :  { %v301_v15 = vrot.slane %v296_v9, 6  ;;  %v1164_v26 = vrot.slane %v85_v11, 9  ;;  %v141_v28 = vld [vmem:[#allocation2] sm:$0x8]  ;;  %v219_v61 = vld [vmem:[#allocation2 + $0x8] sm:$0x1] }
  0x17   :  { %v129_v31 = vld [vmem:[#allocation2 + $0xc] sm:$0xc]  ;;  %v1168_v39 = vrot.slane %v141_v28, 11  ;;  %v242_v62 = vld [vmem:[#allocation2 + $0x14] sm:$0x1]  ;;  %v233_v2 = vshll.u32 %v219_v61, 16 }
  0x18   :  { %v157_v35 = vld [vmem:[#allocation2 + $0xc] sm:$0x8]  ;;  %v1167_v51 = vrot.slane %v129_v31, 10  ;;  %v262_v5 = vld [vmem:[#allocation2 + $0x8] sm:$0x1]  ;;  %v253_v7 = vshll.u32 %v242_v62, 16 }
  0x19   :  { %v212_v12 = vld [vmem:[#allocation2 + $0x10] sm:$0xf]  ;;  %v101_v46 = vld [vmem:[#allocation2 + $0xc] sm:$0xe]  ;;  %v1169_v53 = vrot.slane %v157_v35, 11  ;;  %v267_v9 = vrot.slane %v262_v5, 5 }
  0x1a   :  { %v295_v14 = vld [vmem:[#allocation2 + $0x10] sm:$0xc]  ;;  %214 = vrot.lane.b32.xlu1 %v212_v12, %s1453_s5  ;;  %v206_v16 = vld [vmem:[#allocation2 + $0x4] sm:$0xf]  ;;  %v130_v38 = vld [vmem:[#allocation2 + $0x10] sm:$0x3] }
  0x1b   :  { %v114_v17 = vld [vmem:[#allocation2 + $0x4] sm:$0x3]  ;;  %v285_v18 = vld [vmem:[#allocation2 + $0x4] sm:$0xc]  ;;  %208 = vrot.lane.b32.xlu0 %v206_v16, %s1453_s5  ;;  %v1175_v23 = vrot.slane %v295_v14, 10  ;;  %v135_v52 = vrot.slane %v130_v38, 6 }
  0x1c   :  { %v122_v21 = vrot.slane %v114_v17, 6  ;;  %v1174_v22 = vrot.slane %v285_v18, 10  ;;  %v86_v24 = vld [vmem:[#allocation2 + $0x4] sm:$0x1]  ;;  %v241_v32 = vld [vmem:[#allocation2 + $0x10] sm:$0xf] }
  0x1d   :  { %v94_v27 = vrot.slane %v86_v24, 5  ;;  %v302_v30 = vsel %vm1530_vm7, %v1175_v23, %v301_v15  ;;  %v142_v33 = vld [vmem:[#allocation2 + $0x4] sm:$0x7]  ;;  %v244_v42 = vshrl.u32 %v241_v32, 16  ;;  %v247_v43 = vshll.u32 %v241_v32, 16 }
  0x1e   :  { %v292_v29 = vsel %vm1530_vm7, %v1174_v22, %v291_v13  ;;  %v123_v37 = vsel %vm1530_vm7, %v1166_v20, %v122_v21  ;;  %304 = vst.msk [vmem:[#allocation3 + $0x14] sm:$0xf] %vm58_vm0, %v302_v30  ;;  %v150_v40 = vrot.slane %v142_v33, 7  ;;  %v158_v44 = vld [vmem:[#allocation2 + $0x10] sm:$0x7]  ;;  %v1165_v57 = vrot.slane %v101_v46, 9 }
  0x1f   :  { %294 = vst.msk [vmem:[#allocation3 + $0x8] sm:$0xf] %vm58_vm0, %v292_v29  ;;  %v95_v41 = vsel %vm1536_vm8, %v1164_v26, %v94_v27  ;;  %v218_v45 = vld [vmem:[#allocation2 + $0x4] sm:$0xf]  ;;  %v102_v47 = vld [vmem:[#allocation2 + $0x10] sm:$0x1]  ;;  %v136_v63 = vsel %vm1530_vm7, %v1167_v51, %v135_v52 }
  0x20   :  { %v151_v48 = vsel %vm1547_vm9, %v1168_v39, %v150_v40  ;;  %v224_v49 = vshrl.u32 %v218_v45, 16  ;;  %v227_v50 = vshll.u32 %v218_v45, 16  ;;  %v163_v54 = vrot.slane %v158_v44, 7  ;;  %v261_v4 = vld [vmem:[#allocation2 + $0x4] sm:$0xe]  ;;  %v1372_v45 = vld [vmem:[%s1857_s1 + $0x30] sm:$0xff] }
  0x21   :  { %152 = vrot.lane.b32.xlu2 %v151_v48, %s1455_s21  ;;  %v107_v58 = vrot.slane %v102_v47, 5  ;;  %v246_v59 = vrot.slane %v244_v42, 4  ;;  %v249_v60 = vrot.slane %v247_v43, 5  ;;  %v1172_v8 = vrot.slane %v261_v4, 9  ;;  %v273_v18 = vld [vmem:[#allocation2 + $0x10] sm:$0xe]  ;;  %477 = vmatpush.bf16.msra.mxu0 %v1372_v45 }
  0x22   :  { %124 = vrot.lane.b32.xlu1 %v123_v37, %s1454_s20  ;;  %v226_v55 = vrot.slane %v224_v49, 4  ;;  %v229_v56 = vrot.slane %v227_v50, 5  ;;  %v164_v0 = vsel %vm1547_vm9, %v1169_v53, %v163_v54  ;;  %v235_v11 = vrot.slane %v233_v2, 5  ;;  %v274_v20 = vld [vmem:[#allocation2 + $0x14] sm:$0x1]  ;;  %v1381_v46 = vld [vmem:[%s1857_s1 + $0x78] sm:$0xff] }
  0x23   :  { %96 = vrot.lane.b32.xlu0 %v95_v41, %s1453_s5  ;;  %v108_v3 = vsel %vm1536_vm8, %v1165_v57, %v107_v58  ;;  %v250_v6 = vor.u32 %v249_v60, %v246_v59  ;;  %v255_v13 = vrot.slane %v253_v7, 5  ;;  %v268_v15 = vsel %vm1536_vm8, %v1172_v8, %v267_v9  ;;  %v170_v24 = vld [vmem:[#allocation2 + $0x4] sm:$0xf]  ;;  %v190_v26 = vld [vmem:[#allocation2 + $0x10] sm:$0xf]  ;;  %v1371_v47 = vld [vmem:[%s1857_s1 + $0x28] sm:$0xff]  ;;  %490 = vmatpush.bf16.msra.mxu1 %v1381_v46 }
  0x24   :  { %v230_v1 = vor.u32 %v229_v56, %v226_v55  ;;  %v1173_v21 = vrot.slane %v273_v18, 9  ;;  %v279_v22 = vrot.slane %v274_v20, 5  ;;  %v180_v27 = vshrl.u32 %v170_v24, 16  ;;  %v169_v29 = vld [vmem:[#allocation2] sm:$0x8]  ;;  %v1380_v49 = vld [vmem:[%s1857_s1 + $0x70] sm:$0xff] }
  0x25   :  { %v251_v12 = vrot.slane %v250_v6, 4  ;;  %v197_v28 = vshrl.u32 %v190_v26, 16  ;;  %v189_v30 = vld [vmem:[#allocation2 + $0xc] sm:$0x8]  ;;  %v175_v31 = vshrl.u32 %v169_v29, 16  ;;  %v183_v33 = vshll.u32 %v170_v24, 16  ;;  %478 = vmatpush.bf16.msra.mxu0 %v1371_v47 }
  0x26   :  { %v231_v10 = vrot.slane %v230_v1, 4  ;;  %v280_v23 = vsel %vm1536_vm8, %v1173_v21, %v279_v22  ;;  %v182_v32 = vrot.slane %v180_v27, 7  ;;  %v192_v36 = vshrl.u32 %v189_v30, 16  ;;  %v81_v48 = vld [vmem:[#allocation2] sm:$0xf]  ;;  %v1379_v51 = vld [vmem:[%s1857_s1 + $0x68] sm:$0xff] }
  0x27   :  { %v256_v17 = vsel %vm1573_vm12, %v251_v12, %v255_v13  ;;  %v199_v37 = vrot.slane %v197_v28, 7  ;;  %v200_v38 = vshll.u32 %v190_v26, 16  ;;  %v1170_v39 = vrot.slane %v175_v31, 11  ;;  %82 = vst.msk [vmem:[#allocation3] sm:$0xf] %vm58_vm0, %v81_v48  ;;  %v1370_v50 = vld [vmem:[%s1857_s1 + $0x20] sm:$0xff]  ;;  %491 = vmatpush.bf16.msra.mxu1 %v1380_v49 }
  0x28   :  { %v236_v16 = vsel %vm1573_vm12, %v231_v10, %v235_v11  ;;  %v185_v40 = vor.u32 %v183_v33, %v182_v32  ;;  %v1171_v41 = vrot.slane %v192_v36, 11  ;;  %v1369_v52 = vld [vmem:[%s1857_s1 + $0x18] sm:$0xff]  ;;  %v83_v54 = vld [vmem:[#allocation2 + $0xc] sm:$0xf]  ;;  %v1378_v55 = vld [vmem:[%s1857_s1 + $0x60] sm:$0xff] }
  0x29   :  { %165 = vrot.lane.b32.xlu2 %v164_v0, %s1455_s21  ;;  %v202_v42 = vor.u32 %v200_v38, %v199_v37  ;;  %479 = vmatpush.bf16.msra.mxu0 %v1370_v50  ;;  %v1383_v56 = vld [vmem:[%s1857_s1 + $0x88] sm:$0xff]  ;;  %84 = vst.msk [vmem:[#allocation3 + $0xc] sm:$0xf] %vm58_vm0, %v83_v54  ;;  %v1368_v57 = vld [vmem:[%s1857_s1 + $0x10] sm:$0xff]  ;;  %v1377_v58 = vld [vmem:[%s1857_s1 + $0x58] sm:$0xff] }
  0x2a   :  { %137 = vrot.lane.b32.xlu1 %v136_v63, %s1454_s20  ;;  %v186_v43 = vsel %vm1589_vm15, %v1170_v39, %v185_v40  ;;  %510 = vmatpush.bf16.msra.mxu2 %v1383_v56  ;;  %v1382_v59 = vld [vmem:[%s1857_s1 + $0x80] sm:$0xff]  ;;  %v1367_v60 = vld [vmem:[%s1857_s1 + $0x8] sm:$0xff]  ;;  %v1186_v61 = vld [vmem:[#allocation3 + $0x8] sm:$0xf] }
  0x2b   :  { %109 = vrot.lane.b32.xlu0 %v108_v3, %s1453_s5  ;;  %v203_v44 = vsel %vm1589_vm15, %v1171_v41, %v202_v42  ;;  %188 = vst.msk [vmem:[#allocation3 + $0x4] sm:$0xf] %vm58_vm0, %v186_v43  ;;  %492 = vmatpush.bf16.msra.mxu1 %v1379_v51  ;;  %v1365_v62 = vld [vmem:[#allocation3 + $0x10] sm:$0xf0]  ;;  %v1376_v1 = vld [vmem:[%s1857_s1 + $0x50] sm:$0xff]  ;;  %v1375_v3 = vld [vmem:[%s1857_s1 + $0x48] sm:$0xff] }
  0x2c   :  { %205 = vst.msk [vmem:[#allocation3 + $0x10] sm:$0xf] %vm58_vm0, %v203_v44  ;;  %v1187_v63 = vor.u32 %v1365_v62, %v1186_v61  ;;  %v1366_v2 = vld [vmem:[%s1857_s1] sm:$0xff] }
  0x2d   :  { %480 = vmatpush.bf16.msra.mxu0 %v1369_v52  ;;  %v1374_v4 = vld [vmem:[%s1857_s1 + $0x40] sm:$0xff]  ;;  %s1669_s1 = sld [smem:[#allocation5]] }
  0x2e   :  { %511 = vmatpush.bf16.msra.mxu2 %v1382_v59  ;;  %v1412_v47 = vld [vmem:[%s1859_s3] ss:$0 sm:$0xff] }
  0x2f   :  { %493 = vmatpush.bf16.msra.mxu1 %v1378_v55  ;;  %v1403_v61 = vld [vmem:[%s1858_s2 + $0x80] sm:$0xff] }
  0x31   :  { %237 = vrot.lane.b32.xlu2 %v236_v16, %s1454_s20  ;;  %481 = vmatpush.bf16.msra.mxu0 %v1368_v57 }
  0x32   :  { %269 = vrot.lane.b32.xlu1 %v268_v15, %s1455_s21  ;;  %1260 = vmatmul.msk.bf16.vlgmr.msra.gmra.mxu2 %vm472_vm1, %v1187_v63 }
  0x33   :  { %257 = vrot.lane.b32.xlu0 %v256_v17, %s1454_s20  ;;  %494 = vmatpush.bf16.msra.mxu1 %v1377_v58  ;;  %v557_v55 = vstv %s1669_s1 }
  0x35   :  { %482 = vmatpush.bf16.msra.mxu0 %v1367_v60 }
  0x37   :  { %495 = vmatpush.bf16.msra.mxu1 %v1376_v1 }
  0x39   :  { %281 = vrot.lane.b32.xlu2 %v280_v23, %s1455_s21  ;;  %483 = vmatpush.bf16.msra.mxu0 %v1366_v2 }
  0x3b   :  { %496 = vmatpush.bf16.msra.mxu1 %v1375_v3 }
  0x3f   :  { %497 = vmatpush.bf16.msra.mxu1 %v1374_v4 }
  0x7b   :  { %v153_v53 = vpop.permute.xlu2 %152 }
  0x83   :  { %v166_v0 = vpop.permute.xlu2 %165 }
  0x8b   :  { %v238_v6 = vpop.permute.xlu2 %237 }
  0x8c   :  { %v215_v5 = vpop.permute.xlu1 %214 }
  0x8d   :  { %217 = vst.msk [vmem:[#allocation3 + $0x10] sm:$0xf] %vm99_vm2, %v215_v5  ;;  %v209_v7 = vpop.permute.xlu0 %208 }
  0x8e   :  { %211 = vst.msk [vmem:[#allocation3 + $0x4] sm:$0xf] %vm99_vm2, %v209_v7 }
  0x8f   :  { %240 = vst.msk [vmem:[#allocation3 + $0x4] sm:$0xf] %vm127_vm3, %v238_v6 }
  0x93   :  { %v282_v13 = vpop.permute.xlu2 %281 }
  0x94   :  { %v125_v8 = vpop.permute.xlu1 %124 }
  0x95   :  { %v97_v9 = vpop.permute.xlu0 %96 }
  0x96   :  { %100 = vst.msk [vmem:[#allocation3] sm:$0xf] %vm99_vm2, %v97_v9 }
  0x97   :  { %128 = vst.msk [vmem:[#allocation3] sm:$0xf] %vm127_vm3, %v125_v8 }
  0x98   :  { %156 = vst.msk [vmem:[#allocation3] sm:$0xf] %vm155_vm4, %v153_v53  ;;  %v1404_v53 = vld [vmem:[%s1858_s2 + $0x88] sm:$0xff] }
  0x99   :  { %1005 = vmatpush.bf16.msrb.mxu0 %v1404_v53  ;;  %v635_v53 = vld [vmem:[#allocation2 + $0x24] sm:$0xc] }
  0x9c   :  { %v138_v10 = vpop.permute.xlu1 %137 }
  0x9d   :  { %v110_v11 = vpop.permute.xlu0 %109  ;;  %1006 = vmatpush.bf16.msrb.mxu0 %v1403_v61  ;;  %v688_v61 = vld [vmem:[#allocation2 + $0x24] sm:$0x8] }
  0x9e   :  { %112 = vst.msk [vmem:[#allocation3 + $0xc] sm:$0xf] %vm99_vm2, %v110_v11  ;;  %v623_v11 = vld [vmem:[#allocation2 + $0x18] sm:$0xc] }
  0x9f   :  { %140 = vst.msk [vmem:[#allocation3 + $0xc] sm:$0xf] %vm127_vm3, %v138_v10  ;;  %v1178_v16 = vld [vmem:[#allocation3] sm:$0xf]  ;;  %v647_v10 = vld [vmem:[#allocation2 + $0x18] sm:$0x8] }
  0xa0   :  { %168 = vst.msk [vmem:[#allocation3 + $0xc] sm:$0xf] %vm155_vm4, %v166_v0 }
  0xa4   :  { %v270_v12 = vpop.permute.xlu1 %269 }
  0xa5   :  { %272 = vst.msk [vmem:[#allocation3 + $0x4] sm:$0xf] %vm155_vm4, %v270_v12  ;;  %v258_v15 = vpop.permute.xlu0 %257  ;;  %v718_v12 = vld [vmem:[#allocation2 + $0x20] sm:$0x1] }
  0xa6   :  { %260 = vst.msk [vmem:[#allocation3 + $0x10] sm:$0xf] %vm127_vm3, %v258_v15 }
  0xa7   :  { %284 = vst.msk [vmem:[#allocation3 + $0x10] sm:$0xf] %vm155_vm4, %v282_v13  ;;  %v1364_v17 = vld [vmem:[#allocation3 + $0x8] sm:$0xf0]  ;;  %v782_v13 = vld [vmem:[#allocation2 + $0x20] sm:$0x3] }
  0xa8   :  { %v1179_v18 = vor.u32 %v1364_v17, %v1178_v16  ;;  %v1266_v16 = vrot.slane %v647_v10, 11  ;;  %v738_v10 = vld [vmem:[#allocation2 + $0x2c] sm:$0x1] }
  0xaa   :  { %484 = vmatmul.bf16.vlgmr.msra.gmra.mxu0 %v1179_v18  ;;  %v1264_v18 = vrot.slane %v623_v11, 10 }
  0xac   :  { %v305_v20 = vld [vmem:[#allocation3] sm:$0xff] }
  0xad   :  { %v1363_v21 = vld [vmem:[#allocation3 + $0x4] sm:$0xf]  ;;  %540 = vrot.lane.b32.xlu2 %v305_v20, %s1454_s20  ;;  %524 = vrot.lane.b32.xlu0 %v305_v20, %s1455_s21  ;;  %v518_v27 = vrot.slane %v305_v20, 4  ;;  %v599_v20 = vld [vmem:[#allocation2 + $0x18] sm:$0xe] }
  0xae   :  { %v307_v22 = vld [vmem:[#allocation3 + $0xc] sm:$0xff] }
  0xaf   :  { %v1180_v23 = vld [vmem:[#allocation3 + $0xc] sm:$0xf0]  ;;  %526 = vrot.lane.b32.xlu1 %v307_v22, %s1455_s21  ;;  %v522_v32 = vunpack.c.l.bf16 %v518_v27  ;;  %v519_v39 = vrot.slane %v307_v22, 4 }
  0xb0   :  { %v1183_v24 = vor.u32 %v1363_v21, %v1180_v23  ;;  %v729_v21 = vshll.u32 %v718_v12, 16  ;;  %v671_v23 = vld [vmem:[#allocation2 + $0x18] sm:$0x8]  ;;  %v691_v12 = vshrl.u32 %v688_v61, 16 }
  0xb1   :  { %v523_v46 = vunpack.c.l.bf16 %v519_v39 }
  0xb2   :  { %498 = vmatmul.bf16.vlgmr.msra.gmra.mxu1 %v1183_v24 }
  0xb5   :  { %542 = vrot.lane.b32.xlu0 %v307_v22, %s1454_s20  ;;  %v513_v54 = vpop.f32.mrf.mxu2  ;;  %v787_v22 = vrot.slane %v782_v13, 6 }
  0xbd   :  { %v515_v6 = vpop.f32.mrf.mxu2 }
 0x107   :  { %v541_v26 = vpop.permute.xlu2 %540 }
 0x108   :  { %v544_v29 = vrot.slane %v541_v26, 4 }
 0x10a   :  { %v548_v37 = vunpack.c.l.bf16 %v544_v29 }
 0x11f   :  { %v525_v28 = vpop.permute.xlu0 %524 }
 0x120   :  { %v528_v30 = vrot.slane %v525_v28, 4 }
 0x121   :  { %v527_v31 = vpop.permute.xlu1 %526 }
 0x122   :  { %v532_v33 = vunpack.c.l.bf16 %v528_v30  ;;  %v529_v36 = vrot.slane %v527_v31, 4 }
 0x124   :  { %v534_v38 = vmax.f32 %v522_v32, %v532_v33  ;;  %v533_v41 = vunpack.c.l.bf16 %v529_v36  ;;  %v674_v36 = vshrl.u32 %v671_v23, 16 }
 0x126   :  { %v550_v40 = vmax.f32 %v534_v38, %v548_v37  ;;  %v535_v49 = vmax.f32 %v523_v46, %v533_v41  ;;  %v1262_v41 = vrot.slane %v599_v20, 9 }
 0x127   :  { %v543_v42 = vpop.permute.xlu0 %542  ;;  %v485_v43 = vpop.f32.mrf.mxu0 }
 0x128   :  { %v545_v44 = vrot.slane %v543_v42, 4  ;;  %v552_v45 = vpack.c.bf16 %v550_v40, %v550_v40  ;;  %v486_v51 = vadd.f32 %v1412_v47, %v485_v43 }
 0x12a   :  { %v549_v48 = vunpack.c.l.bf16 %v545_v44  ;;  %v1674_v50 = vunpack.c.l.bf16 %v552_v45  ;;  %v792_v44 = vld [vmem:[#allocation2 + $0x2c] sm:$0x3] }
 0x12c   :  { %v551_v52 = vmax.f32 %v535_v49, %v549_v48  ;;  %v558_v60 = vmul.f32 %v557_v55, %v1674_v50  ;;  %v731_v49 = vrot.slane %v729_v21, 5 }
 0x12e   :  { %v553_v58 = vpack.c.bf16 %v551_v52, %v551_v52 }
 0x12f   :  { %v499_v56 = vpop.f32.mrf.mxu1  ;;  %v487_v62 = vpop.f32.mrf.mxu0 }
 0x130   :  { %v500_v57 = vadd.f32 %v499_v56, %v486_v51  ;;  %v1687_v0 = vunpack.c.l.bf16 %v553_v58  ;;  %v488_v2 = vadd.f32 %v1412_v47, %v487_v62  ;;  %v1268_v51 = vrot.slane %v674_v36, 11 }
 0x131   :  { %v749_v36 = vshll.u32 %v738_v10, 16  ;;  %v1397_v10 = vld [vmem:[%s1858_s2 + $0x50] sm:$0xff] }
 0x132   :  { %v1680_v59 = vadd.f32 %v513_v54, %v500_v57  ;;  %v559_v7 = vmul.f32 %v557_v55, %v1687_v0  ;;  %v797_v54 = vrot.slane %v792_v44, 6 }
 0x134   :  { %v560_v63 = vadd.f32 %v558_v60, %v1680_v59 }
 0x136   :  { %562 = vst.msk [vmem:[#allocation4] sm:$0xff] %vm472_vm1, %v560_v63  ;;  %v589_v1 = vmax.f32 %v560_v63, 0.0 }
 0x137   :  { %v501_v3 = vpop.f32.mrf.mxu1 }
 0x138   :  { %v590_v4 = vpack.c.bf16 %v589_v1, %v589_v1  ;;  %v502_v5 = vadd.f32 %v501_v3, %v488_v2  ;;  %v611_v1 = vld [vmem:[#allocation2 + $0x24] sm:$0xe]  ;;  %v1265_v3 = vrot.slane %v635_v53, 10 }
 0x13a   :  { %591 = vst.msk [vmem:[#allocation2 + $0x1c] sm:$0xf] %vm58_vm0, %v590_v4  ;;  %v1692_v8 = vadd.f32 %v515_v6, %v502_v5  ;;  %v659_v4 = vld [vmem:[#allocation2 + $0x24] sm:$0x8] }
 0x13b   :  { %v1267_v23 = vrot.slane %v659_v4, 11  ;;  %v1399_v4 = vld [vmem:[%s1858_s2 + $0x60] sm:$0xff] }
 0x13c   :  { %v561_v9 = vadd.f32 %v559_v7, %v1692_v8 }
 0x13e   :  { %563 = vst.msk [vmem:[#allocation4 + $0x8] sm:$0xff] %vm472_vm1, %v561_v9  ;;  %v592_v15 = vmax.f32 %v561_v9, 0.0 }
 0x140   :  { %v593_v17 = vpack.c.bf16 %v592_v15, %v592_v15 }
 0x141   :  { %v781_v24 = vld [vmem:[#allocation2 + $0x1c] sm:$0xc]  ;;  %v624_v30 = vld [vmem:[#allocation2 + $0x1c] sm:$0x3] }
 0x142   :  { %v705_v26 = vld [vmem:[#allocation2 + $0x1c] sm:$0xf]  ;;  %v1272_v28 = vrot.slane %v781_v24, 10  ;;  %594 = vst.msk [vmem:[#allocation2 + $0x28] sm:$0xf] %vm58_vm0, %v593_v17  ;;  %v629_v31 = vrot.slane %v624_v30, 6 }
 0x143   :  { %v648_v27 = vld [vmem:[#allocation2 + $0x1c] sm:$0x7]  ;;  %707 = vrot.lane.b32.xlu1 %v705_v26, %s1453_s5 }
 0x144   :  { %v653_v29 = vrot.slane %v648_v27, 7  ;;  %v600_v32 = vld [vmem:[#allocation2 + $0x1c] sm:$0x1]  ;;  %v630_v40 = vsel %vm1530_vm7, %v1264_v18, %v629_v31  ;;  %v788_v43 = vsel %vm1530_vm7, %v1272_v28, %v787_v22  ;;  %v1263_v22 = vrot.slane %v611_v1, 9 }
 0x145   :  { %v717_v33 = vld [vmem:[#allocation2 + $0x1c] sm:$0xf]  ;;  %v605_v42 = vrot.slane %v600_v32, 5  ;;  %631 = vrot.lane.b32.xlu0 %v630_v40, %s1454_s20  ;;  %790 = vst.msk [vmem:[#allocation3 + $0x8] sm:$0xf] %vm58_vm0, %v788_v43  ;;  %v1269_v28 = vrot.slane %v691_v12, 11 }
 0x146   :  { %v654_v37 = vsel %vm1547_vm9, %v1266_v16, %v653_v29  ;;  %v720_v38 = vshrl.u32 %v717_v33, 16  ;;  %v723_v39 = vshll.u32 %v717_v33, 16  ;;  %v672_v45 = vld [vmem:[#allocation2 + $0x1c] sm:$0xf]  ;;  %v1396_v12 = vld [vmem:[%s1858_s2 + $0x48] sm:$0xff] }
 0x147   :  { %655 = vrot.lane.b32.xlu2 %v654_v37, %s1455_s21  ;;  %v679_v48 = vshrl.u32 %v672_v45, 16  ;;  %v682_v56 = vshll.u32 %v672_v45, 16  ;;  %v606_v58 = vsel %vm1536_vm8, %v1262_v41, %v605_v42  ;;  %v758_v41 = vld [vmem:[#allocation2 + $0x20] sm:$0x1]  ;;  %v751_v45 = vrot.slane %v749_v36, 5  ;;  %v1390_v1 = vld [vmem:[%s1858_s2 + $0x18] sm:$0xff] }
 0x148   :  { %v722_v46 = vrot.slane %v720_v38, 4  ;;  %v725_v47 = vrot.slane %v723_v39, 5 }
 0x149   :  { %v681_v55 = vrot.slane %v679_v48, 7  ;;  %v791_v57 = vld [vmem:[#allocation2 + $0x28] sm:$0xc]  ;;  %v636_v60 = vld [vmem:[#allocation2 + $0x28] sm:$0x3] }
 0x14a   :  { %v726_v52 = vor.u32 %v725_v47, %v722_v46  ;;  %v1273_v62 = vrot.slane %v791_v57, 10  ;;  %v737_v5 = vld [vmem:[#allocation2 + $0x28] sm:$0xf]  ;;  %v641_v7 = vrot.slane %v636_v60, 6  ;;  %v757_v46 = vld [vmem:[#allocation2 + $0x1c] sm:$0xe] }
 0x14b   :  { %607 = vrot.lane.b32.xlu1 %v606_v58, %s1453_s5  ;;  %v684_v2 = vor.u32 %v682_v56, %v681_v55  ;;  %v711_v6 = vld [vmem:[#allocation2 + $0x28] sm:$0xf]  ;;  %v740_v16 = vshrl.u32 %v737_v5, 16  ;;  %v743_v17 = vshll.u32 %v737_v5, 16  ;;  %v770_v48 = vld [vmem:[#allocation2 + $0x2c] sm:$0x1]  ;;  %v565_v55 = vstv %s1723_s19 }
 0x14c   :  { %v727_v63 = vrot.slane %v726_v52, 4  ;;  %v798_v9 = vsel %vm1530_vm7, %v1273_v62, %v797_v54  ;;  %v689_v11 = vld [vmem:[#allocation2 + $0x28] sm:$0xf]  ;;  %v642_v31 = vsel %vm1530_vm7, %v1265_v3, %v641_v7  ;;  %v1284_v39 = vld [vmem:[#allocation3 + $0x8] sm:$0xf]  ;;  %v1270_v35 = vrot.slane %v757_v46, 9 }
 0x14d   :  { %v612_v15 = vld [vmem:[#allocation2 + $0x28] sm:$0x1]  ;;  %800 = vst.msk [vmem:[#allocation3 + $0x14] sm:$0xf] %vm58_vm0, %v798_v9  ;;  %v685_v18 = vsel %vm1589_vm15, %v1268_v51, %v684_v2  ;;  %v696_v21 = vshrl.u32 %v689_v11, 16  ;;  %v742_v24 = vrot.slane %v740_v16, 4  ;;  %v566_v56 = vmul.f32 %v565_v55, %v1674_v50 }
 0x14e   :  { %v732_v13 = vsel %vm1573_vm12, %v727_v63, %v731_v49  ;;  %v660_v20 = vld [vmem:[#allocation2 + $0x28] sm:$0x7]  ;;  %687 = vst.msk [vmem:[#allocation3 + $0x4] sm:$0xf] %vm58_vm0, %v685_v18  ;;  %v745_v26 = vrot.slane %v743_v17, 5  ;;  %v617_v27 = vrot.slane %v612_v15, 5  ;;  %v567_v14 = vmul.f32 %v565_v55, %v1687_v0 }
 0x14f   :  { %713 = vrot.lane.b32.xlu2 %v711_v6, %s1453_s5  ;;  %733 = vrot.lane.b32.xlu0 %v732_v13, %s1454_s20  ;;  %v698_v29 = vrot.slane %v696_v21, 7  ;;  %v699_v30 = vshll.u32 %v689_v11, 16  ;;  %v665_v32 = vrot.slane %v660_v20, 7  ;;  %v769_v47 = vld [vmem:[#allocation2 + $0x28] sm:$0xe]  ;;  %v763_v49 = vrot.slane %v758_v41, 5 }
 0x150   :  { %v746_v33 = vor.u32 %v745_v26, %v742_v24  ;;  %v618_v38 = vsel %vm1536_vm8, %v1263_v22, %v617_v27  ;;  %v1271_v34 = vrot.slane %v769_v47, 9  ;;  %v775_v52 = vrot.slane %v770_v48, 5  ;;  %v597_v57 = vld [vmem:[#allocation2 + $0x24] sm:$0xf]  ;;  %v1394_v58 = vld [vmem:[%s1858_s2 + $0x38] sm:$0xff]  ;;  %v1392_v50 = vld [vmem:[%s1858_s2 + $0x28] sm:$0xff] }
 0x151   :  { %v701_v37 = vor.u32 %v699_v30, %v698_v29  ;;  %v666_v19 = vsel %vm1547_vm9, %v1267_v23, %v665_v32  ;;  %v764_v53 = vsel %vm1536_vm8, %v1270_v35, %v763_v49  ;;  %598 = vst.msk [vmem:[#allocation3 + $0xc] sm:$0xf] %vm58_vm0, %v597_v57  ;;  %971 = vmatpush.bf16.msra.mxu3 %v1394_v58  ;;  %v1402_v0 = vld [vmem:[%s1858_s2 + $0x78] sm:$0xff]  ;;  %v1391_v62 = vld [vmem:[%s1858_s2 + $0x20] sm:$0xff]  ;;  %v1401_v63 = vld [vmem:[%s1858_s2 + $0x70] sm:$0xff] }
 0x152   :  { %v747_v44 = vrot.slane %v746_v33, 4  ;;  %v776_v54 = vsel %vm1536_vm8, %v1271_v34, %v775_v52  ;;  %v595_v60 = vld [vmem:[#allocation2 + $0x18] sm:$0xf]  ;;  %985 = vmatpush.bf16.msrb.mxu2 %v1402_v0  ;;  %v1400_v2 = vld [vmem:[%s1858_s2 + $0x68] sm:$0xff]  ;;  %v1389_v3 = vld [vmem:[%s1858_s2 + $0x10] sm:$0xff] }
 0x153   :  { %643 = vrot.lane.b32.xlu1 %v642_v31, %s1454_s20  ;;  %v702_v42 = vsel %vm1589_vm15, %v1269_v28, %v701_v37  ;;  %596 = vst.msk [vmem:[#allocation3] sm:$0xf] %vm58_vm0, %v595_v60  ;;  %v1388_v6 = vld [vmem:[%s1858_s2 + $0x8] sm:$0xff]  ;;  %v1398_v7 = vld [vmem:[%s1858_s2 + $0x58] sm:$0xff]  ;;  %v1387_v9 = vld [vmem:[%s1858_s2] sm:$0xff] }
 0x154   :  { %v1386_v40 = vld [vmem:[#allocation3 + $0x10] sm:$0xf0]  ;;  %704 = vst.msk [vmem:[#allocation3 + $0x10] sm:$0xf] %vm58_vm0, %v702_v42  ;;  %v752_v51 = vsel %vm1573_vm12, %v747_v44, %v751_v45  ;;  %v1413_v57 = vld [vmem:[%s1860_s4] ss:$0 sm:$0xff] }
 0x155   :  { %v1285_v43 = vor.u32 %v1386_v40, %v1284_v39  ;;  %972 = vmatpush.bf16.msra.mxu3 %v1393_v25  ;;  %v1395_v15 = vld [vmem:[%s1858_s2 + $0x40] sm:$0xff]  ;;  %s1821_s2 = sld [smem:[#allocation5 + $0x81]] }
 0x156   :  { %986 = vmatpush.bf16.msrb.mxu2 %v1401_v63 }
 0x157   :  { %619 = vrot.lane.b32.xlu2 %v618_v38, %s1453_s5  ;;  %667 = vrot.lane.b32.xlu0 %v666_v19, %s1455_s21 }
 0x158   :  { %1358 = vmatmul.msk.bf16.vlgmr.msrb.gmra.mxu0 %vm472_vm1, %v1285_v43 }
 0x159   :  { %973 = vmatpush.bf16.msra.mxu3 %v1392_v50 }
 0x15a   :  { %987 = vmatpush.bf16.msrb.mxu2 %v1400_v2 }
 0x15b   :  { %753 = vrot.lane.b32.xlu1 %v752_v51, %s1454_s20 }
 0x15d   :  { %974 = vmatpush.bf16.msra.mxu3 %v1391_v62  ;;  %v1052_v62 = vstv %s1821_s2 }
 0x15e   :  { %988 = vmatpush.bf16.msrb.mxu2 %v1399_v4 }
 0x15f   :  { %765 = vrot.lane.b32.xlu2 %v764_v53, %s1455_s21  ;;  %777 = vrot.lane.b32.xlu0 %v776_v54, %s1455_s21 }
 0x161   :  { %975 = vmatpush.bf16.msra.mxu3 %v1390_v1 }
 0x162   :  { %989 = vmatpush.bf16.msrb.mxu2 %v1398_v7 }
 0x163   :  { %570 = vrot.lane.b32.xlu1 %v566_v56, %s1453_s5 }
 0x165   :  { %976 = vmatpush.bf16.msra.mxu3 %v1389_v3 }
 0x166   :  { %990 = vmatpush.bf16.msrb.mxu2 %v1397_v10 }
 0x167   :  { %572 = vrot.lane.b32.xlu2 %v567_v14, %s1453_s5 }
 0x169   :  { %977 = vmatpush.bf16.msra.mxu3 %v1388_v6 }
 0x16a   :  { %991 = vmatpush.bf16.msrb.mxu2 %v1396_v12 }
 0x16d   :  { %978 = vmatpush.bf16.msra.mxu3 %v1387_v9 }
 0x16e   :  { %992 = vmatpush.bf16.msrb.mxu2 %v1395_v15 }
 0x1a1   :  { %v656_v61 = vpop.permute.xlu2 %655 }
 0x1a9   :  { %v714_v5 = vpop.permute.xlu2 %713 }
 0x1aa   :  { %716 = vst.msk [vmem:[#allocation3 + $0x10] sm:$0xf] %vm99_vm2, %v714_v5 }
 0x1b1   :  { %v620_v11 = vpop.permute.xlu2 %619 }
 0x1b2   :  { %622 = vst.msk [vmem:[#allocation3 + $0xc] sm:$0xf] %vm99_vm2, %v620_v11 }
 0x1b5   :  { %v708_v13 = vpop.permute.xlu1 %707 }
 0x1b6   :  { %710 = vst.msk [vmem:[#allocation3 + $0x4] sm:$0xf] %vm99_vm2, %v708_v13 }
 0x1b7   :  { %v632_v16 = vpop.permute.xlu0 %631 }
 0x1b9   :  { %v766_v20 = vpop.permute.xlu2 %765 }
 0x1bd   :  { %v608_v17 = vpop.permute.xlu1 %607 }
 0x1be   :  { %610 = vst.msk [vmem:[#allocation3] sm:$0xf] %vm99_vm2, %v608_v17 }
 0x1bf   :  { %634 = vst.msk [vmem:[#allocation3] sm:$0xf] %vm127_vm3, %v632_v16 }
 0x1c0   :  { %658 = vst.msk [vmem:[#allocation3] sm:$0xf] %vm155_vm4, %v656_v61 }
 0x1c1   :  { %v734_v18 = vpop.permute.xlu0 %733  ;;  %v573_v26 = vpop.permute.xlu2 %572 }
 0x1c2   :  { %736 = vst.msk [vmem:[#allocation3 + $0x4] sm:$0xf] %vm127_vm3, %v734_v18  ;;  %v577_v27 = vadd.f32 %v573_v26, %v1692_v8 }
 0x1c3   :  { %768 = vst.msk [vmem:[#allocation3 + $0x4] sm:$0xf] %vm155_vm4, %v766_v20  ;;  %v1064_v20 = vld [vmem:[#allocation4] sm:$0xff] }
 0x1c5   :  { %v644_v21 = vpop.permute.xlu1 %643 }
 0x1c6   :  { %646 = vst.msk [vmem:[#allocation3 + $0xc] sm:$0xf] %vm127_vm3, %v644_v21  ;;  %v1066_v21 = vstv %s1063_s30 }
 0x1c7   :  { %v1276_v29 = vld [vmem:[#allocation3] sm:$0xf]  ;;  %v1067_v26 = vmul.f32 %v1066_v21, %v1064_v20 }
 0x1c9   :  { %v668_v22 = vpop.permute.xlu0 %667 }
 0x1ca   :  { %670 = vst.msk [vmem:[#allocation3 + $0xc] sm:$0xf] %vm155_vm4, %v668_v22  ;;  %v801_v23 = vld [vmem:[#allocation3] sm:$0xff]  ;;  %v1072_v22 = vstv %s1360_s10 }
 0x1cb   :  { %1035 = vrot.lane.b32.xlu2 %v801_v23, %s1454_s20  ;;  %1019 = vrot.lane.b32.xlu0 %v801_v23, %s1455_s21  ;;  %v1384_v33 = vld [vmem:[#allocation3 + $0x4] sm:$0xf]  ;;  %v1013_v19 = vrot.slane %v801_v23, 4 }
 0x1cd   :  { %v754_v24 = vpop.permute.xlu1 %753  ;;  %v1017_v45 = vunpack.c.l.bf16 %v1013_v19 }
 0x1ce   :  { %756 = vst.msk [vmem:[#allocation3 + $0x10] sm:$0xf] %vm127_vm3, %v754_v24 }
 0x1d1   :  { %v778_v28 = vpop.permute.xlu0 %777  ;;  %v1385_v30 = vld [vmem:[#allocation3 + $0x8] sm:$0xf0] }
 0x1d2   :  { %780 = vst.msk [vmem:[#allocation3 + $0x10] sm:$0xf] %vm155_vm4, %v778_v28  ;;  %v1277_v31 = vor.u32 %v1385_v30, %v1276_v29 }
 0x1d3   :  { %582 = vrot.lane.b32.xlu2 %v577_v27, %s1455_s21 }
 0x1d4   :  { %979 = vmatmul.bf16.vlgmr.msra.gmra.mxu3 %v1277_v31  ;;  %v1065_v31 = vld [vmem:[#allocation4 + $0x8] sm:$0xff] }
 0x1d5   :  { %v571_v38 = vpop.permute.xlu1 %570  ;;  %v1008_v60 = vpop.f32.mrf.mxu0 }
 0x1d6   :  { %v576_v8 = vadd.f32 %v571_v38, %v1680_v59 }
 0x1d9   :  { %v803_v32 = vld [vmem:[#allocation3 + $0xc] sm:$0xff] }
 0x1da   :  { %v1278_v36 = vld [vmem:[#allocation3 + $0xc] sm:$0xf0]  ;;  %1037 = vrot.lane.b32.xlu0 %v803_v32, %s1454_s20  ;;  %1021 = vrot.lane.b32.xlu1 %v803_v32, %s1455_s21  ;;  %v1014_v35 = vrot.slane %v803_v32, 4 }
 0x1db   :  { %v1281_v37 = vor.u32 %v1384_v33, %v1278_v36  ;;  %v1068_v36 = vmul.f32 %v1066_v21, %v1065_v31 }
 0x1dc   :  { %v1018_v53 = vunpack.c.l.bf16 %v1014_v35 }
 0x1dd   :  { %993 = vmatmul.bf16.vlgmr.msrb.gmra.mxu2 %v1281_v37  ;;  %v1010_v13 = vpop.f32.mrf.mxu0 }
 0x1e2   :  { %580 = vrot.lane.b32.xlu1 %v576_v8, %s1455_s21 }
 0x225   :  { %v1036_v39 = vpop.permute.xlu2 %1035 }
 0x226   :  { %v1039_v46 = vrot.slane %v1036_v39, 4 }
 0x228   :  { %v1043_v49 = vunpack.c.l.bf16 %v1039_v46 }
 0x22d   :  { %v583_v40 = vpop.permute.xlu2 %582 }
 0x22e   :  { %588 = vst.msk [vmem:[#allocation4 + $0x18] sm:$0xff] %vm472_vm1, %v583_v40 }
 0x235   :  { %v1058_v18 = vld [vmem:[#allocation4 + $0x18] sm:$0xff] }
 0x23d   :  { %v1020_v41 = vpop.permute.xlu0 %1019 }
 0x23e   :  { %v1023_v42 = vrot.slane %v1020_v41, 4  ;;  %v1456_v41 = vmov 32.0  }
 0x23f   :  { %1416 = vrcp.f32 %v1456_v41 }
 0x240   :  { %v1027_v44 = vunpack.c.l.bf16 %v1023_v42 }
 0x242   :  { %v1029_v47 = vmax.f32 %v1017_v45, %v1027_v44 }
 0x244   :  { %v1045_v59 = vmax.f32 %v1029_v47, %v1043_v49 }
 0x245   :  { %v1417_v42 = vpop.eup %1416 }
 0x246   :  { %v1047_v56 = vpack.c.bf16 %v1045_v59, %v1045_v59  ;;  %v1084_v19 = vmul.f32 32.0, %v1417_v42  ;;  %vm1088_vm5 = vweird.f32 %v1417_v42 }
 0x248   :  { %v1049_v25 = vunpack.c.l.bf16 %v1047_v56 }
 0x24a   :  { %v1053_v3 = vmul.f32 %v1052_v62, %v1049_v25 }
 0x24c   :  { %v1022_v43 = vpop.permute.xlu1 %1021  ;;  %v1038_v34 = vpop.permute.xlu0 %1037 }
 0x24d   :  { %v1024_v48 = vrot.slane %v1022_v43, 4  ;;  %v1040_v54 = vrot.slane %v1038_v34, 4  ;;  %v1085_v43 = vsub.f32 1.0, %v1084_v19 }
 0x24f   :  { %v1028_v52 = vunpack.c.l.bf16 %v1024_v48  ;;  %v1044_v58 = vunpack.c.l.bf16 %v1040_v54  ;;  %v1086_v44 = vmul.f32 %v1417_v42, %v1085_v43 }
 0x251   :  { %v1030_v14 = vmax.f32 %v1018_v53, %v1028_v52  ;;  %v1087_v45 = vadd.f32 %v1417_v42, %v1086_v44 }
 0x253   :  { %v1046_v50 = vmax.f32 %v1030_v14, %v1044_v58  ;;  %v1089_v46 = vsel %vm1088_vm5, %v1417_v42, %v1087_v45 }
 0x254   :  { %v581_v51 = vpop.permute.xlu1 %580 }
 0x255   :  { %587 = vst.msk [vmem:[#allocation4 + $0x10] sm:$0xff] %vm472_vm1, %v581_v51  ;;  %v1048_v1 = vpack.c.bf16 %v1046_v50, %v1046_v50 }
 0x257   :  { %v980_v55 = vpop.f32.mrf.mxu3  ;;  %v1050_v7 = vunpack.c.l.bf16 %v1048_v1 }
 0x258   :  { %v981_v0 = vadd.f32 %v1413_v57, %v980_v55 }
 0x259   :  { %v1054_v16 = vmul.f32 %v1052_v62, %v1050_v7  ;;  %v1146_v7 = vld [vmem:[%s1856_s0] sm:$0xff]  }
 0x25c   :  { %v1057_v6 = vld [vmem:[#allocation4 + $0x10] sm:$0xff] }
 0x25f   :  { %v982_v4 = vpop.f32.mrf.mxu3 }
 0x260   :  { %v994_v61 = vpop.f32.mrf.mxu2  ;;  %v983_v9 = vadd.f32 %v1413_v57, %v982_v4 }
 0x261   :  { %v995_v63 = vadd.f32 %v994_v61, %v981_v0 }
 0x263   :  { %v1009_v2 = vadd.f32 %v1008_v60, %v995_v63 }
 0x265   :  { %v1055_v5 = vadd.f32 %v1053_v3, %v1009_v2  ;;  %v1414_v2 = vld [vmem:[%s1863_s7] ss:$0 sm:$0xff] }
 0x267   :  { %v1059_v10 = vadd.f32 %v1057_v6, %v1055_v5  ;;  %v1415_v5 = vld [vmem:[%s1864_s8] ss:$0 sm:$0xff] }
 0x268   :  { %v996_v11 = vpop.f32.mrf.mxu2 }
 0x269   :  { %1061 = vst.msk [vmem:[#allocation4 + $0x10] sm:$0xff] %vm472_vm1, %v1059_v10  ;;  %v997_v12 = vadd.f32 %v996_v11, %v983_v9 }
 0x26b   :  { %v1011_v15 = vadd.f32 %v1010_v13, %v997_v12  ;;  %v1147_v12 = vunpack.c.l.bf16 %v1146_v7 }
 0x26d   :  { %v1056_v17 = vadd.f32 %v1054_v16, %v1011_v15 }
 0x26f   :  { %v1060_v23 = vadd.f32 %v1058_v18, %v1056_v17 }
 0x270   :  { %v1070_v24 = vld [vmem:[#allocation4 + $0x10] sm:$0xff] }
 0x271   :  { %1062 = vst.msk [vmem:[#allocation4 + $0x18] sm:$0xff] %vm472_vm1, %v1060_v23  ;;  %v1073_v27 = vmul.f32 %v1072_v22, %v1070_v24  ;;  %v1152_v24 = vunpack.c.h.bf16 %v1146_v7 }
 0x273   :  { %v1075_v28 = vadd.f32 %v1073_v27, %v1067_v26 }
 0x275   :  { %v1077_v29 = vsel %vm472_vm1, %v1075_v28, 0.0  ;;  %v1092_v30 = vmul.f32 %v1075_v28, %v1075_v28 }
 0x276   :  { %1078 = vadd.xlane.f32.xlu0 %v1077_v29 }
 0x277   :  { %v1094_v32 = vsel %vm472_vm1, %v1092_v30, 0.0 }
 0x278   :  { %1095 = vadd.xlane.f32.xlu2 %v1094_v32  ;;  %v1071_v33 = vld [vmem:[#allocation4 + $0x18] sm:$0xff] }
 0x279   :  { %v1074_v37 = vmul.f32 %v1072_v22, %v1071_v33 }
 0x27b   :  { %v1831_v38 = vadd.f32 %v1074_v37, %v1068_v36 }
 0x27d   :  { %v1080_v8 = vsel %vm472_vm1, %v1831_v38, 0.0  ;;  %v1093_v39 = vmul.f32 %v1831_v38, %v1831_v38 }
 0x27e   :  { %1081 = vadd.xlane.f32.xlu1 %v1080_v8 }
 0x27f   :  { %v1097_v40 = vsel %vm472_vm1, %v1093_v39, 0.0 }
 0x280   :  { %1098 = vadd.xlane.f32.xlu2 %v1097_v40 }
 0x2e9   :  { %v1079_v47 = vpop.xlane.xlu0 %1078 }
 0x2ea   :  { %v1090_v48 = vmul.f32 %v1089_v46, %v1079_v47 }
 0x2eb   :  { %v1096_v35 = vpop.xlane.xlu2 %1095 }
 0x2ec   :  { %v1102_v49 = vmul.f32 %v1090_v48, %v1090_v48  ;;  %v1100_v51 = vmul.f32 %v1096_v35, %v1089_v46  ;;  %v1106_v1 = vsub.f32 %v1075_v28, %v1090_v48 }
 0x2ee   :  { %v1104_v34 = vsub.f32 %v1100_v51, %v1102_v49 }
 0x2f0   :  { %v1108_v59 = vadd.f32 1e-08, %v1104_v34 }
 0x2f1   :  { %v1082_v52 = vpop.xlane.xlu1 %1081 }
 0x2f2   :  { %1418 = vrsqrt.f32 %v1108_v59  ;;  %v1091_v53 = vmul.f32 %v1089_v46, %v1082_v52  ;;  %vm1116_vm7 = vweird.f32 %v1108_v59 }
 0x2f3   :  { %v1099_v54 = vpop.xlane.xlu2 %1098 }
 0x2f4   :  { %v1103_v55 = vmul.f32 %v1091_v53, %v1091_v53  ;;  %v1101_v56 = vmul.f32 %v1099_v54, %v1089_v46  ;;  %v1107_v17 = vsub.f32 %v1831_v38, %v1091_v53 }
 0x2f6   :  { %v1105_v14 = vsub.f32 %v1101_v56, %v1103_v55 }
 0x2f8   :  { %v1419_v57 = vpop.eup %1418  ;;  %v1109_v58 = vadd.f32 1e-08, %v1105_v14 }
 0x2f9   :  { %v1111_v25 = vmul.f32 %v1419_v57, %v1108_v59  ;;  %vm1117_vm6 = vweird.f32 %v1419_v57 }
 0x2fa   :  { %1420 = vrsqrt.f32 %v1109_v58  ;;  %vm1118_vm8 = vmor %vm1116_vm7, %vm1117_vm6  ;;  %vm1126_vm10 = vweird.f32 %v1109_v58 }
 0x2fb   :  { %v1112_v50 = vmul.f32 %v1419_v57, %v1111_v25 }
 0x2fd   :  { %v1113_v0 = vmul.f32 0.5, %v1112_v50 }
 0x2ff   :  { %v1114_v60 = vsub.f32 1.5, %v1113_v0 }
 0x300   :  { %v1421_v61 = vpop.eup %1420 }
 0x301   :  { %v1115_v62 = vmul.f32 %v1419_v57, %v1114_v60  ;;  %v1121_v63 = vmul.f32 %v1421_v61, %v1109_v58  ;;  %vm1127_vm9 = vweird.f32 %v1421_v61 }
 0x302   :  { %vm1128_vm11 = vmor %vm1126_vm10, %vm1127_vm9 }
 0x303   :  { %v1119_v3 = vsel %vm1118_vm8, %v1419_v57, %v1115_v62  ;;  %v1122_v4 = vmul.f32 %v1421_v61, %v1121_v63 }
 0x304   :  { %v1130_v6 = vmul.f32 %v1119_v3, %v1106_v1 }
 0x305   :  { %v1123_v9 = vmul.f32 0.5, %v1122_v4 }
 0x306   :  { %v1136_v10 = vmul.f32 %v1414_v2, %v1130_v6 }
 0x307   :  { %v1124_v11 = vsub.f32 1.5, %v1123_v9 }
 0x308   :  { %v1142_v13 = vadd.f32 %v1415_v5, %v1136_v10 }
 0x309   :  { %v1125_v15 = vmul.f32 %v1421_v61, %v1124_v11 }
 0x30a   :  { %v1144_v16 = vmax.f32 %v1142_v13, 0.0 }
 0x30b   :  { %v1129_v18 = vsel %vm1128_vm11, %v1421_v61, %v1125_v15 }
 0x30c   :  { %v1148_v20 = vadd.f32 %v1147_v12, %v1144_v16  ;;  %v1131_v21 = vmul.f32 %v1129_v18, %v1107_v17 }
 0x30e   :  { %v1149_v22 = vpack.c.bf16 %v1148_v20, %v1148_v20  ;;  %v1137_v23 = vmul.f32 %v1414_v2, %v1131_v21 }
 0x310   :  { %1150 = vst.msk [vmem:[%s1865_s9] sm:$0xf] %vm58_vm0, %v1149_v22  ;;  %v1143_v26 = vadd.f32 %v1415_v5, %v1137_v23 }
 0x312   :  { %v1145_v27 = vmax.f32 %v1143_v26, 0.0 }
 0x314   :  { %v1153_v28 = vadd.f32 %v1152_v24, %v1145_v27 }
 0x316   :  { %v1154_v29 = vpack.c.bf16 %v1153_v28, %v1153_v28 }
 0x318   :  { %1362 = vst.msk [vmem:[%s1865_s9 + $0x4] sm:$0xf] %vm58_vm0, %v1154_v29 }
 0x319   :  { %1161 = vsyncpa [#allocation6], 1 }
 0x31a   :  { %1162 = vsyncpa [#allocation8], 1 }

</bundles_post_ra>
